<compile_context>
chip_gen: v7x
topology: tpu7x:2x2x1
jax: 0.10.0
libtpu: 0.0.40
codegen_flags: <defaults>
</compile_context>

<pallas_src>
import math

import numpy as np
import jax
import jax.numpy as jnp
from jax import lax
from jax.experimental import pallas as pl
from jax.experimental.pallas import tpu as pltpu


# ----------------------------- glue: weight prep -----------------------------


def _conv1_band(w):
    """(6,1,5,5) -> (5, 32, 168): out[kh, iw, ow*6+co] = w[co,0,kh,iw-ow]."""
    kh = np.arange(5)
    iw = np.arange(32)
    ow = np.arange(28 * 6) // 6
    co = np.arange(28 * 6) % 6
    kw = iw[:, None] - ow[None, :]                          # (32, 168)
    valid = (kw >= 0) & (kw < 5)
    kwc = np.clip(kw, 0, 4)
    m = w[co[None, None, :], 0, kh[:, None, None], kwc[None, :, :]]
    return jnp.where(jnp.asarray(valid)[None], m, 0.0)      # (5, 32, 168)


def _conv2_band(w):
    """(16,6,5,5) -> (5, 162, 160) on the dilated pooled-1 lane layout.

    Pooled-1 activations live at lanes l = 12*iw + ci (iw<14, ci<6); the other
    lanes are pooling junk and get zero weights.
    out[kh, l, ow*16+co] = w[co, ci, kh, iw-ow]   (0 <= iw-ow < 5).
    """
    kh = np.arange(5)
    l = np.arange(162)
    q, s = l // 12, l % 12
    ow = np.arange(160) // 16
    co = np.arange(160) % 16
    kw = q[:, None] - ow[None, :]                           # (162, 160)
    valid = (s[:, None] < 6) & (kw >= 0) & (kw < 5)
    kwc = np.clip(kw, 0, 4)
    sc = np.clip(s, 0, 5)
    m = w[co[None, None, :], sc[None, :, None], kh[:, None, None], kwc[None, :, :]]
    return jnp.where(jnp.asarray(valid)[None], m, 0.0)      # (5, 162, 160)


def _fc1_blocks(w):
    """(120,400) -> (5, 144, 120) on the dilated pooled-2 lane layout.

    Pooled-2 activations live at lanes l = 32*pw + co (pw<5, co<16); torch
    flatten index is co*25 + ph*5 + pw.
    """
    ph = np.arange(5)
    l = np.arange(144)
    pw, s = l // 32, l % 32
    valid = s < 16
    sc = np.clip(s, 0, 15)
    idx = sc[None, :] * 25 + ph[:, None] * 5 + pw[None, :]  # (5, 144)
    m = jnp.transpose(w[:, idx], (1, 2, 0))                 # (5, 144, 120)
    return jnp.where(jnp.asarray(valid)[None, :, None], m, 0.0)


def _fc1_row_select(bt):
    """(5, bt, 32*bt-15) exact 0/1 gather: S[ph, b, 32*b + 4*ph] = 1."""
    r = 32 * bt - 15
    s = np.zeros((5, bt, r), np.float32)
    for ph in range(5):
        for b in range(bt):
            s[ph, b, 32 * b + 4 * ph] = 1.0
    return s


def _choose_batch_tile(n):
    # Batch is folded into the matmul M dim, so prefer big tiles; multiples of
    # 8 keep the (bt,128) output block sublane-aligned.  Small / odd batches
    # fall back to a single tile (block shape == full array shape).
    for bt in (32, 16, 8):
        if n % bt == 0:
            return bt
    return n


def _const_spec(a):
    nd = a.ndim
    return pl.BlockSpec(a.shape, lambda g: (0,) * nd)


# ------------------------------- Pallas kernel --------------------------------


def lenet5_kernel(x_ref, w1_ref, b1_ref, w2_ref, b2_ref, s_ref, g1_ref,
                  bf1_ref, wf2_ref, bf2_ref, wf3_ref, bf3_ref, o_ref):
    f32, bf16 = jnp.float32, jnp.bfloat16
    rows = x_ref.shape[0]                 # bt*32; sample b = rows [32b, 32b+32)

    def mm(a, b):
        return jnp.dot(a, b, preferred_element_type=f32)

    x = x_ref[...]                                            # (bt*32, 32) bf16

    # conv1: 5 banded matmuls over the whole batch tile (M = bt*32-4).
    r1 = rows - 4
    y1 = mm(x[0:r1, :], w1_ref[0])
    for kh in range(1, 5):
        y1 = y1 + mm(x[kh:kh + r1, :], w1_ref[kh])            # (r1, 168) f32
    # valid rows: 32b+oh (oh<28); lanes ow*6+co

    # pool1 as shifted maxes (VPU); rows/lanes stay dilated; bias+relu after.
    a1 = jnp.maximum(y1[0:r1 - 1, :], y1[1:r1, :])            # rows 32b+2ph
    c1 = jnp.maximum(a1[:, 0:162], a1[:, 6:168])              # lanes 12pw+c
    p1 = jnp.maximum(c1 + b1_ref[...], 0.0).astype(bf16)      # (r1-1, 162)

    # conv2: 5 banded matmuls, row shift 2 (dilated rows), zero-weight junk lanes.
    r2 = rows - 13
    y2 = mm(p1[0:r2, :], w2_ref[0])
    for kh in range(1, 5):
        y2 = y2 + mm(p1[2 * kh:2 * kh + r2, :], w2_ref[kh])   # (r2, 160) f32
    # valid rows: 32b+2oh (oh<10); lanes ow*16+co

    # pool2
    a2 = jnp.maximum(y2[0:r2 - 2, :], y2[2:r2, :])            # rows 32b+4ph
    c2 = jnp.maximum(a2[:, 0:144], a2[:, 16:160])             # lanes 32pw+co
    p2 = jnp.maximum(c2 + b2_ref[...], 0.0).astype(bf16)      # (r2-2, 144)

    # fc1: gather the 5 valid pooled rows per sample (exact 0/1 matmuls) and
    # contract against the permuted/dilated fc1 weight blocks.
    h = mm(mm(s_ref[0], p2).astype(bf16), g1_ref[0])
    for ph in range(1, 5):
        h = h + mm(mm(s_ref[ph], p2).astype(bf16), g1_ref[ph])
    h1 = jnp.maximum(h + bf1_ref[...], 0.0).astype(bf16)      # (bt, 120)

    # fc2 / fc3 (fc3 lanes padded to 128 for a dense store)
    h2 = jnp.maximum(mm(h1, wf2_ref[...]) + bf2_ref[...], 0.0).astype(bf16)
    o_ref[...] = mm(h2, wf3_ref[...]) + bf3_ref[...]          # (bt, 128) f32


# ---------------------------------- wrapper -----------------------------------


def lenet5_forward(params, x):
    """x: (N, 1, 32, 32) float32 -> logits (N, 10) float32."""
    n = x.shape[0]
    bt = _choose_batch_tile(n)
    bf16 = jnp.bfloat16

    x2 = x.reshape(n * 32, 32).astype(bf16)          # batch folded into rows

    w1 = _conv1_band(params["conv1_w"]).astype(bf16)          # (5, 32, 168)
    w2 = _conv2_band(params["conv2_w"]).astype(bf16)          # (5, 162, 160)
    g1 = _fc1_blocks(params["fc1_w"]).astype(bf16)            # (5, 144, 120)
    s = jnp.asarray(_fc1_row_select(bt), bf16)                # (5, bt, 32bt-15)

    b1 = params["conv1_b"][jnp.arange(162) % 6].reshape(1, 162)
    b2 = params["conv2_b"][jnp.arange(144) % 16].reshape(1, 144)
    bf1 = params["fc1_b"].reshape(1, 120)
    wf2 = params["fc2_w"].T.astype(bf16)                      # (120, 84)
    bf2 = params["fc2_b"].reshape(1, 84)
    wf3 = jnp.zeros((84, 128), jnp.float32).at[:, :10].set(params["fc3_w"].T)
    wf3 = wf3.astype(bf16)
    bf3 = jnp.zeros((1, 128), jnp.float32).at[:, :10].set(params["fc3_b"][None, :])

    args = (x2, w1, b1, w2, b2, s, g1, bf1, wf2, bf2, wf3, bf3)

    in_specs = [pl.BlockSpec((bt * 32, 32), lambda g: (g, 0))]
    in_specs += [_const_spec(a) for a in args[1:]]

    rows = bt * 32
    grid_n = n // bt
    flops_tile = 2 * (5 * (rows - 4) * 32 * 168 + 5 * (rows - 13) * 162 * 160
                      + 5 * bt * (rows - 15) * 144 + 5 * bt * 144 * 120
                      + bt * 120 * 84 + bt * 84 * 128)
    bytes_accessed = int(sum(int(a.size) * a.dtype.itemsize for a in args)
                         + n * 128 * 4)

    out = pl.pallas_call(
        lenet5_kernel,
        out_shape=jax.ShapeDtypeStruct((n, 128), jnp.float32),
        grid=(grid_n,),
        in_specs=in_specs,
        out_specs=pl.BlockSpec((bt, 128), lambda g: (g, 0)),
        compiler_params=pltpu.CompilerParams(
            dimension_semantics=("parallel",)),
        cost_estimate=pl.CostEstimate(
            flops=flops_tile * grid_n, transcendentals=0,
            bytes_accessed=bytes_accessed),
    )(*args)
    return out[:, :10]


# --------------------------------- reference ----------------------------------


def lenet5_reference(params, x):
    dn = ("NCHW", "OIHW", "NCHW")
    y = lax.conv_general_dilated(x, params["conv1_w"], (1, 1), "VALID",
                                 dimension_numbers=dn)
    y = jax.nn.relu(y + params["conv1_b"][None, :, None, None])
    y = lax.reduce_window(y, -jnp.inf, lax.max, (1, 1, 2, 2), (1, 1, 2, 2), "VALID")
    y = lax.conv_general_dilated(y, params["conv2_w"], (1, 1), "VALID",
                                 dimension_numbers=dn)
    y = jax.nn.relu(y + params["conv2_b"][None, :, None, None])
    y = lax.reduce_window(y, -jnp.inf, lax.max, (1, 1, 2, 2), (1, 1, 2, 2), "VALID")
    f = y.reshape(y.shape[0], -1)
    f = jax.nn.relu(f @ params["fc1_w"].T + params["fc1_b"])
    f = jax.nn.relu(f @ params["fc2_w"].T + params["fc2_b"])
    return f @ params["fc3_w"].T + params["fc3_b"]


def init_params(key):
    """Deterministic init mirroring torch defaults (uniform +-1/sqrt(fan_in))."""
    ks = jax.random.split(key, 10)

    def u(k, shape, fan_in):
        b = 1.0 / math.sqrt(fan_in)
        return jax.random.uniform(k, shape, jnp.float32, -b, b)

    return {
        "conv1_w": u(ks[0], (6, 1, 5, 5), 25),
        "conv1_b": u(ks[1], (6,), 25),
        "conv2_w": u(ks[2], (16, 6, 5, 5), 150),
        "conv2_b": u(ks[3], (16,), 150),
        "fc1_w": u(ks[4], (120, 400), 400),
        "fc1_b": u(ks[5], (120,), 400),
        "fc2_w": u(ks[6], (84, 120), 120),
        "fc2_b": u(ks[7], (84,), 120),
        "fc3_w": u(ks[8], (10, 84), 84),
        "fc3_b": u(ks[9], (10,), 84),
    }


if __name__ == "__main__":
    key = jax.random.PRNGKey(0)
    pkey, xkey = jax.random.split(key)
    params = init_params(pkey)
    # LeNet-5's 16*5*5 flatten implies a 32x32 single-channel input.
    x = jax.random.normal(xkey, (2, 1, 32, 32), jnp.float32)

    logits = jax.jit(lenet5_forward)(params, x)
    jax.block_until_ready(logits)

    assert logits.shape == (2, 10), logits.shape
    assert bool(jnp.all(jnp.isfinite(logits)))

    ref = lenet5_reference(params, x)
    assert bool(jnp.allclose(logits, ref, rtol=7e-2, atol=7e-2)), (
        float(jnp.max(jnp.abs(logits - ref))))

    print("KERNEL_OK")
</pallas_src>

<mosaic_0001>
module attributes {stable_mosaic.version = 11 : i64} {
  func.func @lenet5_kernel(%arg0: i32, %arg1: memref<64x32xbf16, #tpu.memory_space<vmem>>, %arg2: memref<5x32x168xbf16, #tpu.memory_space<vmem>>, %arg3: memref<1x162xf32, #tpu.memory_space<vmem>>, %arg4: memref<5x162x160xbf16, #tpu.memory_space<vmem>>, %arg5: memref<1x144xf32, #tpu.memory_space<vmem>>, %arg6: memref<5x2x49xbf16, #tpu.memory_space<vmem>>, %arg7: memref<5x144x120xbf16, #tpu.memory_space<vmem>>, %arg8: memref<1x120xf32, #tpu.memory_space<vmem>>, %arg9: memref<120x84xbf16, #tpu.memory_space<vmem>>, %arg10: memref<1x84xf32, #tpu.memory_space<vmem>>, %arg11: memref<84x128xbf16, #tpu.memory_space<vmem>>, %arg12: memref<1x128xf32, #tpu.memory_space<vmem>>, %arg13: memref<2x128xf32, #tpu.memory_space<vmem>>) attributes {dimension_semantics = [#tpu.dimension_semantics<parallel>], iteration_bounds = array<i64: 1>, scalar_prefetch = 0 : i64, scratch_operands = 0 : i64, tpu.core_type = #tpu.core_type<tc>, window_params = [{transform_indices = @transform_0, window_bounds = array<i64: 64, 32>}, {pipeline_mode = #tpu.pipeline_mode<synchronous>, transform_indices = @transform_1, window_bounds = array<i64: 5, 32, 168>}, {pipeline_mode = #tpu.pipeline_mode<synchronous>, transform_indices = @transform_2, window_bounds = array<i64: 1, 162>}, {pipeline_mode = #tpu.pipeline_mode<synchronous>, transform_indices = @transform_3, window_bounds = array<i64: 5, 162, 160>}, {pipeline_mode = #tpu.pipeline_mode<synchronous>, transform_indices = @transform_4, window_bounds = array<i64: 1, 144>}, {pipeline_mode = #tpu.pipeline_mode<synchronous>, transform_indices = @transform_5, window_bounds = array<i64: 5, 2, 49>}, {pipeline_mode = #tpu.pipeline_mode<synchronous>, transform_indices = @transform_6, window_bounds = array<i64: 5, 144, 120>}, {pipeline_mode = #tpu.pipeline_mode<synchronous>, transform_indices = @transform_7, window_bounds = array<i64: 1, 120>}, {pipeline_mode = #tpu.pipeline_mode<synchronous>, transform_indices = @transform_8, window_bounds = array<i64: 120, 84>}, {pipeline_mode = #tpu.pipeline_mode<synchronous>, transform_indices = @transform_9, window_bounds = array<i64: 1, 84>}, {pipeline_mode = #tpu.pipeline_mode<synchronous>, transform_indices = @transform_10, window_bounds = array<i64: 84, 128>}, {pipeline_mode = #tpu.pipeline_mode<synchronous>, transform_indices = @transform_11, window_bounds = array<i64: 1, 128>}, {transform_indices = @transform_12, window_bounds = array<i64: 2, 128>}]} {
    %c0 = arith.constant 0 : index
    %c0_0 = arith.constant 0 : index
    %0 = vector.load %arg1[%c0, %c0_0] : memref<64x32xbf16, #tpu.memory_space<vmem>>, vector<64x32xbf16>
    %1 = vector.extract_strided_slice %0 {offsets = [0, 0], sizes = [60, 32], strides = [1, 1]} : vector<64x32xbf16> to vector<60x32xbf16>
    %c0_1 = arith.constant 0 : index
    %c0_2 = arith.constant 0 : index
    %c0_3 = arith.constant 0 : index
    %2 = vector.load %arg2[%c0_1, %c0_2, %c0_3] : memref<5x32x168xbf16, #tpu.memory_space<vmem>>, vector<1x32x168xbf16>
    %3 = vector.shape_cast %2 : vector<1x32x168xbf16> to vector<32x168xbf16>
    %cst = arith.constant dense<0.000000e+00> : vector<60x168xf32>
    %4 = tpu.matmul %1, %3, %cst {dimension_numbers = #tpu.dot_dimension_numbers<[1], [0], [0], [1], [0, 0, 1, 1], [], []>} : vector<60x32xbf16>, vector<32x168xbf16>, vector<60x168xf32> -> vector<60x168xf32>
    %5 = vector.extract_strided_slice %0 {offsets = [1, 0], sizes = [60, 32], strides = [1, 1]} : vector<64x32xbf16> to vector<60x32xbf16>
    %c1 = arith.constant 1 : index
    %c0_4 = arith.constant 0 : index
    %c0_5 = arith.constant 0 : index
    %6 = vector.load %arg2[%c1, %c0_4, %c0_5] : memref<5x32x168xbf16, #tpu.memory_space<vmem>>, vector<1x32x168xbf16>
    %7 = vector.shape_cast %6 : vector<1x32x168xbf16> to vector<32x168xbf16>
    %cst_6 = arith.constant dense<0.000000e+00> : vector<60x168xf32>
    %8 = tpu.matmul %5, %7, %cst_6 {dimension_numbers = #tpu.dot_dimension_numbers<[1], [0], [0], [1], [0, 0, 1, 1], [], []>} : vector<60x32xbf16>, vector<32x168xbf16>, vector<60x168xf32> -> vector<60x168xf32>
    %9 = arith.addf %4, %8 : vector<60x168xf32>
    %10 = vector.extract_strided_slice %0 {offsets = [2, 0], sizes = [60, 32], strides = [1, 1]} : vector<64x32xbf16> to vector<60x32xbf16>
    %c2 = arith.constant 2 : index
    %c0_7 = arith.constant 0 : index
    %c0_8 = arith.constant 0 : index
    %11 = vector.load %arg2[%c2, %c0_7, %c0_8] : memref<5x32x168xbf16, #tpu.memory_space<vmem>>, vector<1x32x168xbf16>
    %12 = vector.shape_cast %11 : vector<1x32x168xbf16> to vector<32x168xbf16>
    %cst_9 = arith.constant dense<0.000000e+00> : vector<60x168xf32>
    %13 = tpu.matmul %10, %12, %cst_9 {dimension_numbers = #tpu.dot_dimension_numbers<[1], [0], [0], [1], [0, 0, 1, 1], [], []>} : vector<60x32xbf16>, vector<32x168xbf16>, vector<60x168xf32> -> vector<60x168xf32>
    %14 = arith.addf %9, %13 : vector<60x168xf32>
    %15 = vector.extract_strided_slice %0 {offsets = [3, 0], sizes = [60, 32], strides = [1, 1]} : vector<64x32xbf16> to vector<60x32xbf16>
    %c3 = arith.constant 3 : index
    %c0_10 = arith.constant 0 : index
    %c0_11 = arith.constant 0 : index
    %16 = vector.load %arg2[%c3, %c0_10, %c0_11] : memref<5x32x168xbf16, #tpu.memory_space<vmem>>, vector<1x32x168xbf16>
    %17 = vector.shape_cast %16 : vector<1x32x168xbf16> to vector<32x168xbf16>
    %cst_12 = arith.constant dense<0.000000e+00> : vector<60x168xf32>
    %18 = tpu.matmul %15, %17, %cst_12 {dimension_numbers = #tpu.dot_dimension_numbers<[1], [0], [0], [1], [0, 0, 1, 1], [], []>} : vector<60x32xbf16>, vector<32x168xbf16>, vector<60x168xf32> -> vector<60x168xf32>
    %19 = arith.addf %14, %18 : vector<60x168xf32>
    %20 = vector.extract_strided_slice %0 {offsets = [4, 0], sizes = [60, 32], strides = [1, 1]} : vector<64x32xbf16> to vector<60x32xbf16>
    %c4 = arith.constant 4 : index
    %c0_13 = arith.constant 0 : index
    %c0_14 = arith.constant 0 : index
    %21 = vector.load %arg2[%c4, %c0_13, %c0_14] : memref<5x32x168xbf16, #tpu.memory_space<vmem>>, vector<1x32x168xbf16>
    %22 = vector.shape_cast %21 : vector<1x32x168xbf16> to vector<32x168xbf16>
    %cst_15 = arith.constant dense<0.000000e+00> : vector<60x168xf32>
    %23 = tpu.matmul %20, %22, %cst_15 {dimension_numbers = #tpu.dot_dimension_numbers<[1], [0], [0], [1], [0, 0, 1, 1], [], []>} : vector<60x32xbf16>, vector<32x168xbf16>, vector<60x168xf32> -> vector<60x168xf32>
    %24 = arith.addf %19, %23 : vector<60x168xf32>
    %25 = vector.extract_strided_slice %24 {offsets = [0, 0], sizes = [59, 168], strides = [1, 1]} : vector<60x168xf32> to vector<59x168xf32>
    %26 = vector.extract_strided_slice %24 {offsets = [1, 0], sizes = [59, 168], strides = [1, 1]} : vector<60x168xf32> to vector<59x168xf32>
    %27 = arith.maximumf %25, %26 : vector<59x168xf32>
    %28 = vector.extract_strided_slice %27 {offsets = [0, 0], sizes = [59, 162], strides = [1, 1]} : vector<59x168xf32> to vector<59x162xf32>
    %29 = vector.extract_strided_slice %27 {offsets = [0, 6], sizes = [59, 162], strides = [1, 1]} : vector<59x168xf32> to vector<59x162xf32>
    %30 = arith.maximumf %28, %29 : vector<59x162xf32>
    %c0_16 = arith.constant 0 : index
    %c0_17 = arith.constant 0 : index
    %31 = vector.load %arg3[%c0_16, %c0_17] : memref<1x162xf32, #tpu.memory_space<vmem>>, vector<1x162xf32>
    %32 = vector.broadcast %31 : vector<1x162xf32> to vector<59x162xf32>
    %33 = arith.addf %30, %32 : vector<59x162xf32>
    %cst_18 = arith.constant 0.000000e+00 : f32
    %34 = vector.broadcast %cst_18 : f32 to vector<59x162xf32>
    %35 = arith.maximumf %33, %34 : vector<59x162xf32>
    %36 = arith.truncf %35 : vector<59x162xf32> to vector<59x162xbf16>
    %37 = vector.extract_strided_slice %36 {offsets = [0, 0], sizes = [51, 162], strides = [1, 1]} : vector<59x162xbf16> to vector<51x162xbf16>
    %c0_19 = arith.constant 0 : index
    %c0_20 = arith.constant 0 : index
    %c0_21 = arith.constant 0 : index
    %38 = vector.load %arg4[%c0_19, %c0_20, %c0_21] : memref<5x162x160xbf16, #tpu.memory_space<vmem>>, vector<1x162x160xbf16>
    %39 = vector.shape_cast %38 : vector<1x162x160xbf16> to vector<162x160xbf16>
    %cst_22 = arith.constant dense<0.000000e+00> : vector<51x160xf32>
    %40 = tpu.matmul %37, %39, %cst_22 {dimension_numbers = #tpu.dot_dimension_numbers<[1], [0], [0], [1], [0, 0, 1, 1], [], []>} : vector<51x162xbf16>, vector<162x160xbf16>, vector<51x160xf32> -> vector<51x160xf32>
    %41 = vector.extract_strided_slice %36 {offsets = [2, 0], sizes = [51, 162], strides = [1, 1]} : vector<59x162xbf16> to vector<51x162xbf16>
    %c1_23 = arith.constant 1 : index
    %c0_24 = arith.constant 0 : index
    %c0_25 = arith.constant 0 : index
    %42 = vector.load %arg4[%c1_23, %c0_24, %c0_25] : memref<5x162x160xbf16, #tpu.memory_space<vmem>>, vector<1x162x160xbf16>
    %43 = vector.shape_cast %42 : vector<1x162x160xbf16> to vector<162x160xbf16>
    %cst_26 = arith.constant dense<0.000000e+00> : vector<51x160xf32>
    %44 = tpu.matmul %41, %43, %cst_26 {dimension_numbers = #tpu.dot_dimension_numbers<[1], [0], [0], [1], [0, 0, 1, 1], [], []>} : vector<51x162xbf16>, vector<162x160xbf16>, vector<51x160xf32> -> vector<51x160xf32>
    %45 = arith.addf %40, %44 : vector<51x160xf32>
    %46 = vector.extract_strided_slice %36 {offsets = [4, 0], sizes = [51, 162], strides = [1, 1]} : vector<59x162xbf16> to vector<51x162xbf16>
    %c2_27 = arith.constant 2 : index
    %c0_28 = arith.constant 0 : index
    %c0_29 = arith.constant 0 : index
    %47 = vector.load %arg4[%c2_27, %c0_28, %c0_29] : memref<5x162x160xbf16, #tpu.memory_space<vmem>>, vector<1x162x160xbf16>
    %48 = vector.shape_cast %47 : vector<1x162x160xbf16> to vector<162x160xbf16>
    %cst_30 = arith.constant dense<0.000000e+00> : vector<51x160xf32>
    %49 = tpu.matmul %46, %48, %cst_30 {dimension_numbers = #tpu.dot_dimension_numbers<[1], [0], [0], [1], [0, 0, 1, 1], [], []>} : vector<51x162xbf16>, vector<162x160xbf16>, vector<51x160xf32> -> vector<51x160xf32>
    %50 = arith.addf %45, %49 : vector<51x160xf32>
    %51 = vector.extract_strided_slice %36 {offsets = [6, 0], sizes = [51, 162], strides = [1, 1]} : vector<59x162xbf16> to vector<51x162xbf16>
    %c3_31 = arith.constant 3 : index
    %c0_32 = arith.constant 0 : index
    %c0_33 = arith.constant 0 : index
    %52 = vector.load %arg4[%c3_31, %c0_32, %c0_33] : memref<5x162x160xbf16, #tpu.memory_space<vmem>>, vector<1x162x160xbf16>
    %53 = vector.shape_cast %52 : vector<1x162x160xbf16> to vector<162x160xbf16>
    %cst_34 = arith.constant dense<0.000000e+00> : vector<51x160xf32>
    %54 = tpu.matmul %51, %53, %cst_34 {dimension_numbers = #tpu.dot_dimension_numbers<[1], [0], [0], [1], [0, 0, 1, 1], [], []>} : vector<51x162xbf16>, vector<162x160xbf16>, vector<51x160xf32> -> vector<51x160xf32>
    %55 = arith.addf %50, %54 : vector<51x160xf32>
    %56 = vector.extract_strided_slice %36 {offsets = [8, 0], sizes = [51, 162], strides = [1, 1]} : vector<59x162xbf16> to vector<51x162xbf16>
    %c4_35 = arith.constant 4 : index
    %c0_36 = arith.constant 0 : index
    %c0_37 = arith.constant 0 : index
    %57 = vector.load %arg4[%c4_35, %c0_36, %c0_37] : memref<5x162x160xbf16, #tpu.memory_space<vmem>>, vector<1x162x160xbf16>
    %58 = vector.shape_cast %57 : vector<1x162x160xbf16> to vector<162x160xbf16>
    %cst_38 = arith.constant dense<0.000000e+00> : vector<51x160xf32>
    %59 = tpu.matmul %56, %58, %cst_38 {dimension_numbers = #tpu.dot_dimension_numbers<[1], [0], [0], [1], [0, 0, 1, 1], [], []>} : vector<51x162xbf16>, vector<162x160xbf16>, vector<51x160xf32> -> vector<51x160xf32>
    %60 = arith.addf %55, %59 : vector<51x160xf32>
    %61 = vector.extract_strided_slice %60 {offsets = [0, 0], sizes = [49, 160], strides = [1, 1]} : vector<51x160xf32> to vector<49x160xf32>
    %62 = vector.extract_strided_slice %60 {offsets = [2, 0], sizes = [49, 160], strides = [1, 1]} : vector<51x160xf32> to vector<49x160xf32>
    %63 = arith.maximumf %61, %62 : vector<49x160xf32>
    %64 = vector.extract_strided_slice %63 {offsets = [0, 0], sizes = [49, 144], strides = [1, 1]} : vector<49x160xf32> to vector<49x144xf32>
    %65 = vector.extract_strided_slice %63 {offsets = [0, 16], sizes = [49, 144], strides = [1, 1]} : vector<49x160xf32> to vector<49x144xf32>
    %66 = arith.maximumf %64, %65 : vector<49x144xf32>
    %c0_39 = arith.constant 0 : index
    %c0_40 = arith.constant 0 : index
    %67 = vector.load %arg5[%c0_39, %c0_40] : memref<1x144xf32, #tpu.memory_space<vmem>>, vector<1x144xf32>
    %68 = vector.broadcast %67 : vector<1x144xf32> to vector<49x144xf32>
    %69 = arith.addf %66, %68 : vector<49x144xf32>
    %cst_41 = arith.constant 0.000000e+00 : f32
    %70 = vector.broadcast %cst_41 : f32 to vector<49x144xf32>
    %71 = arith.maximumf %69, %70 : vector<49x144xf32>
    %72 = arith.truncf %71 : vector<49x144xf32> to vector<49x144xbf16>
    %c0_42 = arith.constant 0 : index
    %c0_43 = arith.constant 0 : index
    %c0_44 = arith.constant 0 : index
    %73 = vector.load %arg6[%c0_42, %c0_43, %c0_44] : memref<5x2x49xbf16, #tpu.memory_space<vmem>>, vector<1x2x49xbf16>
    %74 = vector.shape_cast %73 : vector<1x2x49xbf16> to vector<2x49xbf16>
    %cst_45 = arith.constant dense<0.000000e+00> : vector<2x144xf32>
    %75 = tpu.matmul %74, %72, %cst_45 {dimension_numbers = #tpu.dot_dimension_numbers<[1], [0], [0], [1], [0, 0, 1, 1], [], []>} : vector<2x49xbf16>, vector<49x144xbf16>, vector<2x144xf32> -> vector<2x144xf32>
    %76 = arith.truncf %75 : vector<2x144xf32> to vector<2x144xbf16>
    %c0_46 = arith.constant 0 : index
    %c0_47 = arith.constant 0 : index
    %c0_48 = arith.constant 0 : index
    %77 = vector.load %arg7[%c0_46, %c0_47, %c0_48] : memref<5x144x120xbf16, #tpu.memory_space<vmem>>, vector<1x144x120xbf16>
    %78 = vector.shape_cast %77 : vector<1x144x120xbf16> to vector<144x120xbf16>
    %cst_49 = arith.constant dense<0.000000e+00> : vector<2x120xf32>
    %79 = tpu.matmul %76, %78, %cst_49 {dimension_numbers = #tpu.dot_dimension_numbers<[1], [0], [0], [1], [0, 0, 1, 1], [], []>} : vector<2x144xbf16>, vector<144x120xbf16>, vector<2x120xf32> -> vector<2x120xf32>
    %c1_50 = arith.constant 1 : index
    %c0_51 = arith.constant 0 : index
    %c0_52 = arith.constant 0 : index
    %80 = vector.load %arg6[%c1_50, %c0_51, %c0_52] : memref<5x2x49xbf16, #tpu.memory_space<vmem>>, vector<1x2x49xbf16>
    %81 = vector.shape_cast %80 : vector<1x2x49xbf16> to vector<2x49xbf16>
    %cst_53 = arith.constant dense<0.000000e+00> : vector<2x144xf32>
    %82 = tpu.matmul %81, %72, %cst_53 {dimension_numbers = #tpu.dot_dimension_numbers<[1], [0], [0], [1], [0, 0, 1, 1], [], []>} : vector<2x49xbf16>, vector<49x144xbf16>, vector<2x144xf32> -> vector<2x144xf32>
    %83 = arith.truncf %82 : vector<2x144xf32> to vector<2x144xbf16>
    %c1_54 = arith.constant 1 : index
    %c0_55 = arith.constant 0 : index
    %c0_56 = arith.constant 0 : index
    %84 = vector.load %arg7[%c1_54, %c0_55, %c0_56] : memref<5x144x120xbf16, #tpu.memory_space<vmem>>, vector<1x144x120xbf16>
    %85 = vector.shape_cast %84 : vector<1x144x120xbf16> to vector<144x120xbf16>
    %cst_57 = arith.constant dense<0.000000e+00> : vector<2x120xf32>
    %86 = tpu.matmul %83, %85, %cst_57 {dimension_numbers = #tpu.dot_dimension_numbers<[1], [0], [0], [1], [0, 0, 1, 1], [], []>} : vector<2x144xbf16>, vector<144x120xbf16>, vector<2x120xf32> -> vector<2x120xf32>
    %87 = arith.addf %79, %86 : vector<2x120xf32>
    %c2_58 = arith.constant 2 : index
    %c0_59 = arith.constant 0 : index
    %c0_60 = arith.constant 0 : index
    %88 = vector.load %arg6[%c2_58, %c0_59, %c0_60] : memref<5x2x49xbf16, #tpu.memory_space<vmem>>, vector<1x2x49xbf16>
    %89 = vector.shape_cast %88 : vector<1x2x49xbf16> to vector<2x49xbf16>
    %cst_61 = arith.constant dense<0.000000e+00> : vector<2x144xf32>
    %90 = tpu.matmul %89, %72, %cst_61 {dimension_numbers = #tpu.dot_dimension_numbers<[1], [0], [0], [1], [0, 0, 1, 1], [], []>} : vector<2x49xbf16>, vector<49x144xbf16>, vector<2x144xf32> -> vector<2x144xf32>
    %91 = arith.truncf %90 : vector<2x144xf32> to vector<2x144xbf16>
    %c2_62 = arith.constant 2 : index
    %c0_63 = arith.constant 0 : index
    %c0_64 = arith.constant 0 : index
    %92 = vector.load %arg7[%c2_62, %c0_63, %c0_64] : memref<5x144x120xbf16, #tpu.memory_space<vmem>>, vector<1x144x120xbf16>
    %93 = vector.shape_cast %92 : vector<1x144x120xbf16> to vector<144x120xbf16>
    %cst_65 = arith.constant dense<0.000000e+00> : vector<2x120xf32>
    %94 = tpu.matmul %91, %93, %cst_65 {dimension_numbers = #tpu.dot_dimension_numbers<[1], [0], [0], [1], [0, 0, 1, 1], [], []>} : vector<2x144xbf16>, vector<144x120xbf16>, vector<2x120xf32> -> vector<2x120xf32>
    %95 = arith.addf %87, %94 : vector<2x120xf32>
    %c3_66 = arith.constant 3 : index
    %c0_67 = arith.constant 0 : index
    %c0_68 = arith.constant 0 : index
    %96 = vector.load %arg6[%c3_66, %c0_67, %c0_68] : memref<5x2x49xbf16, #tpu.memory_space<vmem>>, vector<1x2x49xbf16>
    %97 = vector.shape_cast %96 : vector<1x2x49xbf16> to vector<2x49xbf16>
    %cst_69 = arith.constant dense<0.000000e+00> : vector<2x144xf32>
    %98 = tpu.matmul %97, %72, %cst_69 {dimension_numbers = #tpu.dot_dimension_numbers<[1], [0], [0], [1], [0, 0, 1, 1], [], []>} : vector<2x49xbf16>, vector<49x144xbf16>, vector<2x144xf32> -> vector<2x144xf32>
    %99 = arith.truncf %98 : vector<2x144xf32> to vector<2x144xbf16>
    %c3_70 = arith.constant 3 : index
    %c0_71 = arith.constant 0 : index
    %c0_72 = arith.constant 0 : index
    %100 = vector.load %arg7[%c3_70, %c0_71, %c0_72] : memref<5x144x120xbf16, #tpu.memory_space<vmem>>, vector<1x144x120xbf16>
    %101 = vector.shape_cast %100 : vector<1x144x120xbf16> to vector<144x120xbf16>
    %cst_73 = arith.constant dense<0.000000e+00> : vector<2x120xf32>
    %102 = tpu.matmul %99, %101, %cst_73 {dimension_numbers = #tpu.dot_dimension_numbers<[1], [0], [0], [1], [0, 0, 1, 1], [], []>} : vector<2x144xbf16>, vector<144x120xbf16>, vector<2x120xf32> -> vector<2x120xf32>
    %103 = arith.addf %95, %102 : vector<2x120xf32>
    %c4_74 = arith.constant 4 : index
    %c0_75 = arith.constant 0 : index
    %c0_76 = arith.constant 0 : index
    %104 = vector.load %arg6[%c4_74, %c0_75, %c0_76] : memref<5x2x49xbf16, #tpu.memory_space<vmem>>, vector<1x2x49xbf16>
    %105 = vector.shape_cast %104 : vector<1x2x49xbf16> to vector<2x49xbf16>
    %cst_77 = arith.constant dense<0.000000e+00> : vector<2x144xf32>
    %106 = tpu.matmul %105, %72, %cst_77 {dimension_numbers = #tpu.dot_dimension_numbers<[1], [0], [0], [1], [0, 0, 1, 1], [], []>} : vector<2x49xbf16>, vector<49x144xbf16>, vector<2x144xf32> -> vector<2x144xf32>
    %107 = arith.truncf %106 : vector<2x144xf32> to vector<2x144xbf16>
    %c4_78 = arith.constant 4 : index
    %c0_79 = arith.constant 0 : index
    %c0_80 = arith.constant 0 : index
    %108 = vector.load %arg7[%c4_78, %c0_79, %c0_80] : memref<5x144x120xbf16, #tpu.memory_space<vmem>>, vector<1x144x120xbf16>
    %109 = vector.shape_cast %108 : vector<1x144x120xbf16> to vector<144x120xbf16>
    %cst_81 = arith.constant dense<0.000000e+00> : vector<2x120xf32>
    %110 = tpu.matmul %107, %109, %cst_81 {dimension_numbers = #tpu.dot_dimension_numbers<[1], [0], [0], [1], [0, 0, 1, 1], [], []>} : vector<2x144xbf16>, vector<144x120xbf16>, vector<2x120xf32> -> vector<2x120xf32>
    %111 = arith.addf %103, %110 : vector<2x120xf32>
    %c0_82 = arith.constant 0 : index
    %c0_83 = arith.constant 0 : index
    %112 = vector.load %arg8[%c0_82, %c0_83] : memref<1x120xf32, #tpu.memory_space<vmem>>, vector<1x120xf32>
    %113 = vector.broadcast %112 : vector<1x120xf32> to vector<2x120xf32>
    %114 = arith.addf %111, %113 : vector<2x120xf32>
    %cst_84 = arith.constant 0.000000e+00 : f32
    %115 = vector.broadcast %cst_84 : f32 to vector<2x120xf32>
    %116 = arith.maximumf %114, %115 : vector<2x120xf32>
    %117 = arith.truncf %116 : vector<2x120xf32> to vector<2x120xbf16>
    %c0_85 = arith.constant 0 : index
    %c0_86 = arith.constant 0 : index
    %118 = vector.load %arg9[%c0_85, %c0_86] : memref<120x84xbf16, #tpu.memory_space<vmem>>, vector<120x84xbf16>
    %cst_87 = arith.constant dense<0.000000e+00> : vector<2x84xf32>
    %119 = tpu.matmul %117, %118, %cst_87 {dimension_numbers = #tpu.dot_dimension_numbers<[1], [0], [0], [1], [0, 0, 1, 1], [], []>} : vector<2x120xbf16>, vector<120x84xbf16>, vector<2x84xf32> -> vector<2x84xf32>
    %c0_88 = arith.constant 0 : index
    %c0_89 = arith.constant 0 : index
    %120 = vector.load %arg10[%c0_88, %c0_89] : memref<1x84xf32, #tpu.memory_space<vmem>>, vector<1x84xf32>
    %121 = vector.broadcast %120 : vector<1x84xf32> to vector<2x84xf32>
    %122 = arith.addf %119, %121 : vector<2x84xf32>
    %cst_90 = arith.constant 0.000000e+00 : f32
    %123 = vector.broadcast %cst_90 : f32 to vector<2x84xf32>
    %124 = arith.maximumf %122, %123 : vector<2x84xf32>
    %125 = arith.truncf %124 : vector<2x84xf32> to vector<2x84xbf16>
    %c0_91 = arith.constant 0 : index
    %c0_92 = arith.constant 0 : index
    %126 = vector.load %arg11[%c0_91, %c0_92] : memref<84x128xbf16, #tpu.memory_space<vmem>>, vector<84x128xbf16>
    %cst_93 = arith.constant dense<0.000000e+00> : vector<2x128xf32>
    %127 = tpu.matmul %125, %126, %cst_93 {dimension_numbers = #tpu.dot_dimension_numbers<[1], [0], [0], [1], [0, 0, 1, 1], [], []>} : vector<2x84xbf16>, vector<84x128xbf16>, vector<2x128xf32> -> vector<2x128xf32>
    %c0_94 = arith.constant 0 : index
    %c0_95 = arith.constant 0 : index
    %128 = vector.load %arg12[%c0_94, %c0_95] : memref<1x128xf32, #tpu.memory_space<vmem>>, vector<1x128xf32>
    %129 = vector.broadcast %128 : vector<1x128xf32> to vector<2x128xf32>
    %130 = arith.addf %127, %129 : vector<2x128xf32>
    %c0_96 = arith.constant 0 : index
    %c0_97 = arith.constant 0 : index
    %131 = vector.load %arg13[%c0_96, %c0_97] : memref<2x128xf32, #tpu.memory_space<vmem>>, vector<2x128xf32>
    tpu.vector_store %arg13[%c0_96, %c0_97], %130 {strides = array<i32>} : memref<2x128xf32, #tpu.memory_space<vmem>>, vector<2x128xf32>,
    return
  }
  func.func @transform_0(%arg0: i32) -> (i32, i32) {
    %c0_i32 = arith.constant 0 : i32
    %c0_i32_0 = arith.constant 0 : i32
    return %arg0, %c0_i32 : i32, i32
  }
  func.func @transform_1(%arg0: i32) -> (i32, i32, i32) {
    %c0_i32 = arith.constant 0 : i32
    %c0_i32_0 = arith.constant 0 : i32
    %c0_i32_1 = arith.constant 0 : i32
    %c0_i32_2 = arith.constant 0 : i32
    return %c0_i32, %c0_i32_0, %c0_i32_1 : i32, i32, i32
  }
  func.func @transform_2(%arg0: i32) -> (i32, i32) {
    %c0_i32 = arith.constant 0 : i32
    %c0_i32_0 = arith.constant 0 : i32
    %c0_i32_1 = arith.constant 0 : i32
    return %c0_i32, %c0_i32_0 : i32, i32
  }
  func.func @transform_3(%arg0: i32) -> (i32, i32, i32) {
    %c0_i32 = arith.constant 0 : i32
    %c0_i32_0 = arith.constant 0 : i32
    %c0_i32_1 = arith.constant 0 : i32
    %c0_i32_2 = arith.constant 0 : i32
    return %c0_i32, %c0_i32_0, %c0_i32_1 : i32, i32, i32
  }
  func.func @transform_4(%arg0: i32) -> (i32, i32) {
    %c0_i32 = arith.constant 0 : i32
    %c0_i32_0 = arith.constant 0 : i32
    %c0_i32_1 = arith.constant 0 : i32
    return %c0_i32, %c0_i32_0 : i32, i32
  }
  func.func @transform_5(%arg0: i32) -> (i32, i32, i32) {
    %c0_i32 = arith.constant 0 : i32
    %c0_i32_0 = arith.constant 0 : i32
    %c0_i32_1 = arith.constant 0 : i32
    %c0_i32_2 = arith.constant 0 : i32
    return %c0_i32, %c0_i32_0, %c0_i32_1 : i32, i32, i32
  }
  func.func @transform_6(%arg0: i32) -> (i32, i32, i32) {
    %c0_i32 = arith.constant 0 : i32
    %c0_i32_0 = arith.constant 0 : i32
    %c0_i32_1 = arith.constant 0 : i32
    %c0_i32_2 = arith.constant 0 : i32
    return %c0_i32, %c0_i32_0, %c0_i32_1 : i32, i32, i32
  }
  func.func @transform_7(%arg0: i32) -> (i32, i32) {
    %c0_i32 = arith.constant 0 : i32
    %c0_i32_0 = arith.constant 0 : i32
    %c0_i32_1 = arith.constant 0 : i32
    return %c0_i32, %c0_i32_0 : i32, i32
  }
  func.func @transform_8(%arg0: i32) -> (i32, i32) {
    %c0_i32 = arith.constant 0 : i32
    %c0_i32_0 = arith.constant 0 : i32
    %c0_i32_1 = arith.constant 0 : i32
    return %c0_i32, %c0_i32_0 : i32, i32
  }
  func.func @transform_9(%arg0: i32) -> (i32, i32) {
    %c0_i32 = arith.constant 0 : i32
    %c0_i32_0 = arith.constant 0 : i32
    %c0_i32_1 = arith.constant 0 : i32
    return %c0_i32, %c0_i32_0 : i32, i32
  }
  func.func @transform_10(%arg0: i32) -> (i32, i32) {
    %c0_i32 = arith.constant 0 : i32
    %c0_i32_0 = arith.constant 0 : i32
    %c0_i32_1 = arith.constant 0 : i32
    return %c0_i32, %c0_i32_0 : i32, i32
  }
  func.func @transform_11(%arg0: i32) -> (i32, i32) {
    %c0_i32 = arith.constant 0 : i32
    %c0_i32_0 = arith.constant 0 : i32
    %c0_i32_1 = arith.constant 0 : i32
    return %c0_i32, %c0_i32_0 : i32, i32
  }
  func.func @transform_12(%arg0: i32) -> (i32, i32) {
    %c0_i32 = arith.constant 0 : i32
    %c0_i32_0 = arith.constant 0 : i32
    return %arg0, %c0_i32 : i32, i32
  }
}

</mosaic_0001>

<bundles_post_ra>
// kernel: lenet5_forward.1
= control target key start
LH: loop header
LB: loop body
LE: loop exit
PB: predicated region body
PF: predicated region fallthrough
CT: control target
= control target key end

     0   :  { %v4313_v2 = vmov 0   ;;  %vm132_vm0 = vcmask 261120   ;;  %vm600_vm1 = vcmask 1045504   ;;  %vm80_vm2 = vsmask.f32 7424  ;;  %s5679_s0 = inlined_call_operand.vmem [shape: bf16[64,32], index: 0, kind: input, shape index: {}]   ;;  %s5680_s1 = inlined_call_operand.vmem [shape: bf16[5,32,168], index: 1, kind: input, shape index: {}]   ;;  %s5681_s2 = inlined_call_operand.vmem [shape: f32[1,162], index: 2, kind: input, shape index: {}]   ;;  %s5682_s3 = inlined_call_operand.vmem [shape: bf16[5,162,160], index: 3, kind: input, shape index: {}]   ;;  %s5683_s4 = inlined_call_operand.vmem [shape: f32[1,144], index: 4, kind: input, shape index: {}]   ;;  %s5684_s5 = inlined_call_operand.vmem [shape: bf16[5,2,49], index: 5, kind: input, shape index: {}]   ;;  %s5685_s6 = inlined_call_operand.vmem [shape: bf16[5,144,120], index: 6, kind: input, shape index: {}]   ;;  %s5686_s7 = inlined_call_operand.vmem [shape: f32[1,120], index: 7, kind: input, shape index: {}]   ;;  %s5687_s8 = inlined_call_operand.vmem [shape: bf16[120,84], index: 8, kind: input, shape index: {}]   ;;  %s5688_s9 = inlined_call_operand.vmem [shape: f32[1,84], index: 9, kind: input, shape index: {}]   ;;  %s5689_s10 = inlined_call_operand.vmem [shape: bf16[84,128], index: 10, kind: input, shape index: {}]   ;;  %s5690_s11 = inlined_call_operand.vmem [shape: f32[1,128], index: 11, kind: input, shape index: {}]   ;;  %s5691_s12 = inlined_call_operand.hbm [shape: f32[2,128], index: 12, kind: output, shape index: {}]  }
   0x1   :  { %v4036_v0 = vld [vmem:[%s5680_s1 + $0x4] ss:$8 sps:$4 sm:$0xff]   ;;  %v4038_v1 = vld [vmem:[%s5680_s1] ss:$8 sps:$4 sm:$0xff]   ;;  %278 = vmatprep.mubr.bf16.mxu0 %v4313_v2  ;;  %177 = vmatprep.mubr.bf16.mxu1 %v4313_v2  ;;  %v4039_v3 = vld [vmem:[%s5680_s1 + $0x14] ss:$8 sps:$4 sm:$0xff]  }
   0x2   :  { %246 = vmatprep.subr.bf16.mxu0 %v4036_v0  ;;  %v4041_v4 = vld [vmem:[%s5680_s1 + $0x10] ss:$8 sps:$4 sm:$0xff]   ;;  %v4045_v5 = vld [vmem:[%s5680_s1 + $0x44] ss:$8 sps:$4 sm:$0xff]   ;;  %v4043_v7 = vld [vmem:[%s5680_s1 + $0x40] ss:$8 sps:$4 sm:$0xff]  }
   0x3   :  { %247 = vmatpush1.bf16.msra.mxu0 %v4038_v1  ;;  %v4404_v6 = vld [vmem:[%s5679_s0] sm:$0xff]   ;;  %v4050_v8 = vld [vmem:[%s5680_s1 + $0x54] ss:$8 sps:$4 sm:$0xff]   ;;  %v4048_v9 = vld [vmem:[%s5680_s1 + $0x50] ss:$8 sps:$4 sm:$0xff]   ;;  %vm324_vm3 = vcmask 1046528  }
   0x4   :  { %248 = vmatprep.subr.bf16.mxu0 %v4039_v3  ;;  %v4054_v10 = vld [vmem:[%s5680_s1 + $0x64] ss:$8 sps:$4 sm:$0xff]   ;;  %v84_v13 = vshll.u32 %v4404_v6, 16  ;;  %v4433_v14 = vld [vmem:[%s5679_s0 + $0x10] sm:$0xff]   ;;  %v4066_v16 = vld [vmem:[%s5680_s1 + $0x20] ss:$8 sps:$4 sm:$0xff]  }
   0x5   :  { %v4424_v11 = vld [vmem:[%s5679_s0 + $0x8] sm:$0xff]   ;;  %v4442_v17 = vld [vmem:[%s5679_s0 + $0x18] sm:$0xff]   ;;  %v82_v18 = vshrl.u32 %v4404_v6, 16  ;;  %v601_v23 = vrot.slane %v4404_v6, 2  ;;  %v604_v26 = vrot.slane %v4433_v14, 2  ;;  %v97_v33 = vshll.u32 %v4433_v14, 16 }
   0x6   :  { %v4061_v12 = vld [vmem:[%s5680_s1 + $0x24] ss:$8 sps:$4 sm:$0xff]   ;;  %v89_v15 = vshll.u32 %v4424_v11, 16  ;;  %v4067_v19 = vld [vmem:[%s5680_s1 + $0x34] ss:$8 sps:$4 sm:$0xff]   ;;  %v86_v20 = vrot.slane %v84_v13, 1 }
   0x7   :  { %249 = vmatpush1.bf16.msra.mxu0 %v4041_v4  ;;  %145 = vmatprep.subr.bf16.mxu1 %v4061_v12  ;;  %v4069_v21 = vld [vmem:[%s5680_s1 + $0x30] ss:$8 sps:$4 sm:$0xff]   ;;  %v602_v25 = vrot.slane %v4424_v11, 2  ;;  %v606_v28 = vrot.slane %v4442_v17, 2  ;;  %v93_v32 = vshrl.u32 %v4424_v11, 16  ;;  %v99_v35 = vrot.slane %v97_v33, 1 }
   0x8   :  { %364 = vmatprep.subr.bf16.mxu0 %v4045_v5  ;;  %146 = vmatpush1.bf16.msra.mxu1 %v4066_v16  ;;  %v91_v22 = vrot.slane %v89_v15, 1  ;;  %v87_v24 = vor.u32 %v86_v20, %v82_v18  ;;  %v101_v37 = vshrl.u32 %v4433_v14, 16  ;;  %v105_v38 = vshll.u32 %v4442_v17, 16  ;;  %v4052_v43 = vld [vmem:[%s5680_s1 + $0x60] ss:$8 sps:$4 sm:$0xff]  }
   0x9   :  { %147 = vmatprep.subr.bf16.mxu1 %v4067_v19  ;;  %v4462_v27 = vsel %vm600_vm1, %v601_v23, %v602_v25  ;;  %v4467_v30 = vsel %vm600_vm1, %v602_v25, %v604_v26  ;;  %v4472_v31 = vsel %vm600_vm1, %v604_v26, %v606_v28  ;;  %v325_v41 = vrot.slane %v4404_v6, 1  ;;  %v4057_v44 = vld [vmem:[%s5680_s1 + $0x74] ss:$8 sps:$4 sm:$0xff]   ;;  %v4055_v47 = vld [vmem:[%s5680_s1 + $0x70] ss:$8 sps:$4 sm:$0xff]  }
   0xa   :  { %3441 = vmatmul.mubr.msk.bf16.vlgmr.msra.gmra.mrb[0].mxu0 %vm132_vm0, %v4404_v6  ;;  %v92_v29 = vsel %vm80_vm2, %v87_v24, %v91_v22  ;;  %v95_v34 = vor.u32 %v93_v32, %v91_v22  ;;  %v103_v39 = vor.u32 %v101_v37, %v99_v35  ;;  %v107_v40 = vrot.slane %v105_v38, 1  ;;  %v4060_v48 = vld [vmem:[%s5680_s1 + $0x84] ss:$8 sps:$4 sm:$0xff]   ;;  %v4058_v1 = vld [vmem:[%s5680_s1 + $0x80] ss:$8 sps:$4 sm:$0xff]  }
   0xb   :  { %365 = vmatpush1.bf16.msra.mxu0 %v4043_v7  ;;  %288 = vmatprep.mubr.bf16.mxu0 %v4313_v2  ;;  %v326_v42 = vrot.slane %v4424_v11, 1  ;;  %v328_v49 = vrot.slane %v4433_v14, 1  ;;  %v109_v50 = vshrl.u32 %v4442_v17, 16  ;;  %v459_v53 = vrot.slane %v82_v18, 1  ;;  %v4065_v3 = vld [vmem:[%s5680_s1 + $0x94] ss:$8 sps:$4 sm:$0xff]  }
   0xc   :  { %366 = vmatprep.subr.bf16.mxu0 %v4050_v8  ;;  %148 = vmatpush1.bf16.msra.mxu1 %v4069_v21  ;;  %v100_v36 = vsel %vm80_vm2, %v95_v34, %v99_v35  ;;  %v108_v45 = vsel %vm80_vm2, %v103_v39, %v107_v40  ;;  %v330_v54 = vrot.slane %v4442_v17, 1  ;;  %v460_v55 = vrot.slane %v84_v13, 2  ;;  %v4063_v5 = vld [vmem:[%s5680_s1 + $0x90] ss:$8 sps:$4 sm:$0xff]  }
   0xd   :  { %v327_v46 = vsel %vm324_vm3, %v325_v41, %v326_v42  ;;  %v111_v51 = vor.u32 %v109_v50, %v107_v40  ;;  %v329_v52 = vsel %vm324_vm3, %v326_v42, %v328_v49  ;;  %v462_v56 = vrot.slane %v93_v32, 1 }
   0xe   :  { %v463_v57 = vrot.slane %v89_v15, 2  ;;  %v466_v58 = vrot.slane %v101_v37, 1  ;;  %v467_v59 = vrot.slane %v97_v33, 2  ;;  %v470_v60 = vrot.slane %v109_v50, 1 }
   0xf   :  { %367 = vmatpush1.bf16.msra.mxu0 %v4048_v9  ;;  %3433 = vmatmul.mubr.msk.bf16.vlgmr.msra.gmra.mrb[0].mxu1 %vm132_vm0, %v92_v29  ;;  %v471_v61 = vrot.slane %v105_v38, 2  ;;  %v331_v62 = vsel %vm324_vm3, %v328_v49, %v330_v54  ;;  %vm458_vm4 = vsmask.f32 6400  ;;  %v461_v63 = vor.u32 %v460_v55, %v459_v53 }
  0x10   :  { %506 = vmatprep.subr.bf16.mxu0 %v4054_v10  ;;  %187 = vmatprep.mubr.bf16.mxu1 %v4313_v2  ;;  %v464_v0 = vor.u32 %v463_v57, %v462_v56  ;;  %v468_v6 = vor.u32 %v467_v59, %v466_v58 }
  0x11   :  { %v472_v8 = vor.u32 %v471_v61, %v470_v60 }
  0x12   :  { %3442 = vmatmul.mubr.msk.bf16.gmra.mrb[4].mxu0 %vm132_vm0, %v4424_v11  ;;  %v465_v4 = vsel %vm458_vm4, %v461_v63, %v464_v0  ;;  %v469_v7 = vsel %vm458_vm4, %v464_v0, %v468_v6 }
  0x13   :  { %298 = vmatprep.mubr.bf16.mxu0 %v4313_v2  ;;  %v473_v9 = vsel %vm458_vm4, %v468_v6, %v472_v8 }
  0x17   :  { %3434 = vmatmul.mubr.msk.bf16.gmra.mrb[4].mxu1 %vm132_vm0, %v100_v36 }
  0x18   :  { %197 = vmatprep.mubr.bf16.mxu1 %v4313_v2 }
  0x1a   :  { %3443 = vmatmul.mubr.msk.bf16.gmra.mrb[8].mxu0 %vm132_vm0, %v4433_v14 }
  0x1b   :  { %308 = vmatprep.mubr.bf16.mxu0 %v4313_v2 }
  0x1f   :  { %3435 = vmatmul.mubr.msk.bf16.gmra.mrb[8].mxu1 %vm132_vm0, %v108_v45 }
  0x20   :  { %207 = vmatprep.mubr.bf16.mxu1 %v4313_v2 }
  0x22   :  { %3444 = vmatmul.mubr.msk.bf16.gmra.mrb[12].mxu0 %vm132_vm0, %v4442_v17 }
  0x23   :  { %396 = vmatprep.mubr.bf16.mxu0 %v4313_v2 }
  0x27   :  { %3436 = vmatmul.mubr.msk.bf16.gmra.mrb[12].mxu1 %vm132_vm0, %v111_v51 }
  0x2a   :  { %3453 = vmatmul.mubr.msk.bf16.vlgmr.msra.gmra.mrb[0].mxu0 %vm132_vm0, %v327_v46 }
  0x2b   :  { %507 = vmatpush1.bf16.msra.mxu0 %v4052_v43  ;;  %406 = vmatprep.mubr.bf16.mxu0 %v4313_v2 }
  0x2c   :  { %508 = vmatprep.subr.bf16.mxu0 %v4057_v44 }
  0x2f   :  { %509 = vmatpush1.bf16.msra.mxu0 %v4055_v47 }
  0x30   :  { %640 = vmatprep.subr.bf16.mxu0 %v4060_v48 }
  0x32   :  { %3454 = vmatmul.mubr.msk.bf16.gmra.mrb[4].mxu0 %vm132_vm0, %v329_v52 }
  0x33   :  { %416 = vmatprep.mubr.bf16.mxu0 %v4313_v2 }
  0x3a   :  { %3455 = vmatmul.mubr.msk.bf16.gmra.mrb[8].mxu0 %vm132_vm0, %v331_v62 }
  0x3b   :  { %426 = vmatprep.mubr.bf16.mxu0 %v4313_v2 }
  0x42   :  { %3456 = vmatmul.mubr.msk.bf16.gmra.mrb[12].mxu0 %vm132_vm0, %v330_v54 }
  0x43   :  { %538 = vmatprep.mubr.bf16.mxu0 %v4313_v2 }
  0x4a   :  { %3465 = vmatmul.mubr.msk.bf16.vlgmr.msra.gmra.mrb[0].mxu0 %vm132_vm0, %v465_v4 }
  0x4b   :  { %641 = vmatpush1.bf16.msra.mxu0 %v4058_v1  ;;  %548 = vmatprep.mubr.bf16.mxu0 %v4313_v2 }
  0x4c   :  { %642 = vmatprep.subr.bf16.mxu0 %v4065_v3 }
  0x4f   :  { %643 = vmatpush1.bf16.msra.mxu0 %v4063_v5 }
  0x52   :  { %3466 = vmatmul.mubr.msk.bf16.gmra.mrb[4].mxu0 %vm132_vm0, %v469_v7 }
  0x53   :  { %558 = vmatprep.mubr.bf16.mxu0 %v4313_v2 }
  0x5a   :  { %3467 = vmatmul.mubr.msk.bf16.gmra.mrb[8].mxu0 %vm132_vm0, %v473_v9 }
  0x5b   :  { %17 = vsyncpa [#allocation3], 0  ;;  %568 = vmatprep.mubr.bf16.mxu0 %v4313_v2  ;;  %v4070_v10 = vld [vmem:[%s5682_s3 + $0xa8] ss:$8 sps:$4 sm:$0xff]   ;;  %v4072_v11 = vld [vmem:[%s5682_s3 + $0xac] ss:$8 sps:$4 sm:$0xff]  }
  0x5c   :  { %v4075_v12 = vld [vmem:[%s5682_s3 + $0xbc] ss:$8 sps:$4 sm:$0xff]   ;;  %1143 = vmatprep.subr.bf16.mxu1 %v4072_v11  ;;  %v4073_v14 = vld [vmem:[%s5682_s3 + $0xb8] ss:$8 sps:$4 sm:$0xff]   ;;  %v4078_v16 = vld [vmem:[%s5682_s3 + $0xcc] ss:$8 sps:$4 sm:$0xff]  }
  0x5d   :  { %1144 = vmatpush1.bf16.msra.mxu1 %v4070_v10  ;;  %v4076_v19 = vld [vmem:[%s5682_s3 + $0xc8] ss:$8 sps:$4 sm:$0xff]   ;;  %v4081_v20 = vld [vmem:[%s5682_s3 + $0xdc] ss:$8 sps:$4 sm:$0xff]   ;;  %v4079_v22 = vld [vmem:[%s5682_s3 + $0xd8] ss:$8 sps:$4 sm:$0xff]  }
  0x5e   :  { %1145 = vmatprep.subr.bf16.mxu1 %v4075_v12  ;;  %v4082_v34 = vld [vmem:[%s5682_s3 + $0xe8] ss:$8 sps:$4 sm:$0xff]   ;;  %v4084_v35 = vld [vmem:[%s5682_s3 + $0xec] ss:$8 sps:$4 sm:$0xff]   ;;  %v4087_v37 = vld [vmem:[%s5682_s3 + $0xfc] ss:$8 sps:$4 sm:$0xff]  }
  0x5f   :  { %v4085_v40 = vld [vmem:[%s5682_s3 + $0xf8] ss:$8 sps:$4 sm:$0xff]   ;;  %v4090_v46 = vld [vmem:[%s5682_s3 + $0x10c] ss:$8 sps:$4 sm:$0xff]   ;;  %v4088_v49 = vld [vmem:[%s5682_s3 + $0x108] ss:$8 sps:$4 sm:$0xff]  }
  0x60   :  { %v4093_v56 = vld [vmem:[%s5682_s3 + $0x11c] ss:$8 sps:$4 sm:$0xff]   ;;  %v4091_v60 = vld [vmem:[%s5682_s3 + $0x118] ss:$8 sps:$4 sm:$0xff]   ;;  %s4314_s24 = smov 122   ;;  %vm1136_vm5 = vcmask 1040384  }
  0x61   :  { %1146 = vmatpush1.bf16.msra.mxu1 %v4073_v14  ;;  %v4096_v5 = vld [vmem:[%s5682_s3 + $0x12c] ss:$8 sps:$4 sm:$0xff]   ;;  %vm856_vm6 = vcmask 998400   ;;  %vm1123_vm7 = vcmask 277504   ;;  %vm1678_vm8 = vcmask 1044480   ;;  %vm1927_vm9 = vcmask 1043456  }
  0x62   :  { %3468 = vmatmul.mubr.msk.bf16.gmra.mrb[12].mxu0 %vm132_vm0, %v472_v8  ;;  %1147 = vmatprep.subr.bf16.mxu1 %v4078_v16  ;;  %v4094_v8 = vld [vmem:[%s5682_s3 + $0x128] ss:$8 sps:$4 sm:$0xff]   ;;  %vm2265_vm10 = vcmask 916480   ;;  %vm2350_vm11 = vcmask 400384   ;;  %vm2544_vm12 = vcmask 130048   ;;  %vm4317_vm13 = vmmov 0  }
  0x63   :  { %672 = vmatprep.mubr.bf16.mxu0 %v4313_v2  ;;  %vm3257_vm14 = vcmask 982016   ;;  %vm3362_vm15 = vcmask 1041408   ;;  %s4318_s28 = smov [#allocation2]  }
  0x64   :  { %s3413_s29 = sshll.u32 %s4318_s28, 4  ;;  %s3414_s29 = int_to_ptr.vmem [resolvable:$true] %s3413_s29 }
  0x65   :  { %1148 = vmatpush1.bf16.msra.mxu1 %v4076_v19  ;;  %p4294_p1 = scmp.lt.s32.totalorder %s3414_s29, %s3414_s29 }
  0x66   :  { %1149 = vmatprep.subr.bf16.mxu1 %v4081_v20 }
  0x69   :  { %1150 = vmatpush1.bf16.msra.mxu1 %v4079_v22 }
  0x6a   :  { %3477 = vmatmul.mubr.msk.bf16.vlgmr.msra.gmra.mrb[0].mxu0 %vm132_vm0, %v4462_v27  ;;  %1151 = vmatprep.subr.bf16.mxu1 %v4084_v35 }
  0x6b   :  { %682 = vmatprep.mubr.bf16.mxu0 %v4313_v2 }
  0x6d   :  { %1152 = vmatpush1.bf16.msra.mxu1 %v4082_v34 }
  0x6e   :  { %1153 = vmatprep.subr.bf16.mxu1 %v4087_v37 }
  0x71   :  { %1154 = vmatpush1.bf16.msra.mxu1 %v4085_v40 }
  0x72   :  { %3478 = vmatmul.mubr.msk.bf16.gmra.mrb[4].mxu0 %vm132_vm0, %v4467_v30  ;;  %1155 = vmatprep.subr.bf16.mxu1 %v4090_v46 }
  0x73   :  { %692 = vmatprep.mubr.bf16.mxu0 %v4313_v2 }
  0x75   :  { %1156 = vmatpush1.bf16.msra.mxu1 %v4088_v49 }
  0x76   :  { %1157 = vmatprep.subr.bf16.mxu1 %v4093_v56 }
  0x79   :  { %1158 = vmatpush1.bf16.msra.mxu1 %v4091_v60 }
  0x7a   :  { %3479 = vmatmul.mubr.msk.bf16.gmra.mrb[8].mxu0 %vm132_vm0, %v4472_v31  ;;  %1159 = vmatprep.subr.bf16.mxu1 %v4096_v5  ;;  %v899_v5 = vlaneseq }
  0x7b   :  { %702 = vmatprep.mubr.bf16.mxu0 %v4313_v2 }
  0x7d   :  { %1160 = vmatpush1.bf16.msra.mxu1 %v4094_v8 }
  0x82   :  { %3480 = vmatmul.mubr.msk.bf16.gmra.mrb[12].mxu0 %vm132_vm0, %v606_v28  ;;  %vm3358_vm0 = vcmask 687104  }
  0x83   :  { %2394 = vmatprep.mubr.bf16.mxu0 %v4313_v2 }
  0xe2   :  { %v179_v13 = vpop.f32.mrb[0].mxu1 }
  0xe3   :  { %v181_v15 = vpop.f32.mrb[1].mxu1 }
  0xe4   :  { %v183_v17 = vpop.f32.mrb[2].mxu1 }
  0xe5   :  { %v185_v18 = vpop.f32.mrb[3].mxu1 }
  0xea   :  { %v189_v21 = vpop.f32.mrb[4].mxu1 }
  0xeb   :  { %v191_v23 = vpop.f32.mrb[5].mxu1 }
  0xec   :  { %v193_v24 = vpop.f32.mrb[6].mxu1 }
  0xed   :  { %v195_v25 = vpop.f32.mrb[7].mxu1 }
  0xf2   :  { %v4582_v26 = vpop.f32.mrb[8].mxu1 }
  0xf3   :  { %v4584_v27 = vpop.f32.mrb[9].mxu1 }
  0xf4   :  { %v4586_v28 = vpop.f32.mrb[10].mxu1 }
  0xf5   :  { %v4588_v29 = vpop.f32.mrb[11].mxu1 }
  0xfa   :  { %v4590_v30 = vpop.f32.mrb[12].mxu1 }
  0xfb   :  { %v4592_v31 = vpop.f32.mrb[13].mxu1 }
  0xfc   :  { %v4594_v32 = vpop.f32.mrb[14].mxu1 }
  0xfd   :  { %v4596_v33 = vpop.f32.mrb[15].mxu1 }
 0x13d   :  { %v674_v36 = vpop.f32.mrb[0].mxu0 }
 0x13e   :  { %v3902_v38 = vadd.f32 %v674_v36, %v179_v13  ;;  %v676_v39 = vpop.f32.mrb[1].mxu0 }
 0x13f   :  { %v3903_v41 = vadd.f32 %v676_v39, %v181_v15  ;;  %v678_v42 = vpop.f32.mrb[2].mxu0 }
 0x140   :  { %v3904_v43 = vadd.f32 %v678_v42, %v183_v17  ;;  %v680_v44 = vpop.f32.mrb[3].mxu0  ;;  %v746_v47 = vrot.slane %v3902_v38, 1  ;;  %v4099_v17 = vld [vmem:[%s5682_s3 + $0x13c] ss:$8 sps:$4 sm:$0xff]  }
 0x141   :  { %v3905_v45 = vadd.f32 %v680_v44, %v185_v18  ;;  %v749_v50 = vrot.slane %v3903_v41, 1  ;;  %1161 = vmatprep.subr.bf16.mxu1 %v4099_v17 }
 0x142   :  { %v747_v48 = vrot.slane %v3904_v43, 1 }
 0x143   :  { %v750_v51 = vrot.slane %v3905_v45, 1 }
 0x144   :  { %v748_v52 = vsel %vm324_vm3, %v746_v47, %v747_v48  ;;  %v4104_v47 = vld [vmem:[%s5682_s3 + $0x4] ss:$8 sps:$4 sm:$0xff]  }
 0x145   :  { %v684_v53 = vpop.f32.mrb[4].mxu0  ;;  %v4617_v54 = vmax.f32 %v3902_v38, %v748_v52  ;;  %v751_v55 = vsel %vm324_vm3, %v749_v50, %v750_v51 }
 0x146   :  { %v3906_v57 = vadd.f32 %v684_v53, %v189_v21  ;;  %v686_v58 = vpop.f32.mrb[5].mxu0  ;;  %v4623_v59 = vmax.f32 %v3903_v41, %v751_v55  ;;  %v4097_v21 = vld [vmem:[%s5682_s3 + $0x138] ss:$8 sps:$4 sm:$0xff]  }
 0x147   :  { %v3907_v61 = vadd.f32 %v686_v58, %v191_v23  ;;  %v688_v62 = vpop.f32.mrb[6].mxu0  ;;  %824 = vrot.lane.b32.xlu0 %v4617_v54, %s4314_s24  ;;  %1162 = vmatpush1.bf16.msra.mxu1 %v4097_v21 }
 0x148   :  { %v752_v63 = vrot.slane %v3906_v57, 1  ;;  %v3908_v0 = vadd.f32 %v688_v62, %v193_v24  ;;  %v690_v1 = vpop.f32.mrb[7].mxu0 }
 0x149   :  { %v754_v3 = vrot.slane %v3907_v61, 1  ;;  %v3909_v4 = vadd.f32 %v690_v1, %v195_v25 }
 0x14a   :  { %v756_v6 = vrot.slane %v3908_v0, 1  ;;  %v753_v7 = vsel %vm324_vm3, %v747_v48, %v752_v63 }
 0x14b   :  { %v758_v9 = vrot.slane %v3909_v4, 1  ;;  %826 = vrot.lane.b32.xlu0 %v4623_v59, %s4314_s24  ;;  %v4639_v10 = vmax.f32 %v3904_v43, %v753_v7  ;;  %v755_v11 = vsel %vm324_vm3, %v750_v51, %v754_v3  ;;  %v4728_v7 = vshrl.u32 %v899_v5, 7 }
 0x14c   :  { %v757_v12 = vsel %vm324_vm3, %v752_v63, %v756_v6  ;;  %v4643_v13 = vmax.f32 %v3905_v45, %v755_v11 }
 0x14d   :  { %v694_v14 = vpop.f32.mrb[8].mxu0  ;;  %828 = vrot.lane.b32.xlu1 %v4639_v10, %s4314_s24  ;;  %v4647_v15 = vmax.f32 %v3906_v57, %v757_v12  ;;  %v759_v16 = vsel %vm324_vm3, %v754_v3, %v758_v9  ;;  %v897_v12 = vld [vmem:[%s5681_s2] sm:$0x3] }
 0x14e   :  { %v3910_v18 = vadd.f32 %v694_v14, %v4582_v26  ;;  %v696_v19 = vpop.f32.mrb[9].mxu0  ;;  %v4654_v20 = vmax.f32 %v3907_v61, %v759_v16  ;;  %v3501_v26 = vld [vmem:[%s5682_s3 + $0x148] sm:$0x11]  ;;  %v901_v14 = vsub.s32 0, %v4728_v7 }
 0x14f   :  { %v3911_v22 = vadd.f32 %v696_v19, %v4584_v27  ;;  %v698_v23 = vpop.f32.mrb[10].mxu0  ;;  %832 = vrot.lane.b32.xlu0 %v4647_v15, %s4314_s24  ;;  %v3523_v27 = vcombine.high %v3501_v26, %v3501_v26  ;;  %v3522_v37 = vcombine.low %v3501_v26, %v3501_v26 }
 0x150   :  { %v760_v24 = vrot.slane %v3910_v18, 1  ;;  %v3912_v25 = vadd.f32 %v698_v23, %v4586_v28  ;;  %v700_v34 = vpop.f32.mrb[11].mxu0 }
 0x151   :  { %v762_v35 = vrot.slane %v3911_v22, 1  ;;  %v3913_v36 = vadd.f32 %v700_v34, %v4588_v29  ;;  %830 = vrot.lane.b32.xlu1 %v4643_v13, %s4314_s24  ;;  %3524 = vmatprep.subr.msk.bf16.mxu1 %vm1136_vm5, %v3523_v27  ;;  %v1138_v42 = vsel %vm1136_vm5, %v3522_v37, 0 }
 0x152   :  { %v764_v38 = vrot.slane %v3912_v25, 1  ;;  %v761_v39 = vsel %vm324_vm3, %v756_v6, %v760_v24  ;;  %1164 = vmatpush1.bf16.msra.mxu1 %v1138_v42 }
 0x153   :  { %v766_v40 = vrot.slane %v3913_v36, 1  ;;  %v4670_v28 = vmax.f32 %v3908_v0, %v761_v39  ;;  %v763_v41 = vsel %vm324_vm3, %v758_v9, %v762_v35  ;;  %1337 = vmatprep.subr.bf16.mxu1 %v4104_v47  ;;  %v905_v9 = vsub.s32 1, %v4728_v7 }
 0x154   :  { %v4675_v43 = vmax.f32 %v3909_v4, %v763_v41  ;;  %v765_v29 = vsel %vm324_vm3, %v760_v24, %v764_v38 }
 0x155   :  { %v704_v44 = vpop.f32.mrb[12].mxu0  ;;  %834 = vrot.lane.b32.xlu1 %v4654_v20, %s4314_s24  ;;  %836 = vrot.lane.b32.xlu0 %v4670_v28, %s4314_s24  ;;  %v4682_v45 = vmax.f32 %v3910_v18, %v765_v29  ;;  %v767_v46 = vsel %vm324_vm3, %v762_v35, %v766_v40  ;;  %v4738_v17 = vrot.slane %v897_v12, %v905_v9 }
 0x156   :  { %v3914_v48 = vadd.f32 %v704_v44, %v4590_v30  ;;  %v706_v49 = vpop.f32.mrb[13].mxu0  ;;  %v4689_v50 = vmax.f32 %v3911_v22, %v767_v46  ;;  %v4743_v22 = vrot.slane %v897_v12, %v901_v14 }
 0x157   :  { %v3915_v51 = vadd.f32 %v706_v49, %v4592_v31  ;;  %v708_v52 = vpop.f32.mrb[14].mxu0 }
 0x158   :  { %v768_v53 = vrot.slane %v3914_v48, 1  ;;  %v3916_v55 = vadd.f32 %v708_v52, %v4594_v32  ;;  %v710_v56 = vpop.f32.mrb[15].mxu0 }
 0x159   :  { %v770_v57 = vrot.slane %v3915_v51, 1  ;;  %v3917_v58 = vadd.f32 %v710_v56, %v4596_v33  ;;  %838 = vrot.lane.b32.xlu1 %v4675_v43, %s4314_s24  ;;  %840 = vrot.lane.b32.xlu0 %v4682_v45, %s4314_s24 }
 0x15a   :  { %v772_v30 = vrot.slane %v3916_v55, 1  ;;  %v769_v60 = vsel %vm324_vm3, %v764_v38, %v768_v53 }
 0x15b   :  { %v774_v61 = vrot.slane %v3917_v58, 1  ;;  %v4699_v31 = vmax.f32 %v3912_v25, %v769_v60  ;;  %v771_v62 = vsel %vm324_vm3, %v766_v40, %v770_v57 }
 0x15c   :  { %v4702_v63 = vmax.f32 %v3913_v36, %v771_v62  ;;  %v773_v32 = vsel %vm324_vm3, %v768_v53, %v772_v30  ;;  %v4718_v3 = vmax.f32 %v3916_v55, %v772_v30 }
 0x15d   :  { %842 = vrot.lane.b32.xlu1 %v4689_v50, %s4314_s24  ;;  %844 = vrot.lane.b32.xlu0 %v4699_v31, %s4314_s24  ;;  %v4709_v33 = vmax.f32 %v3914_v48, %v773_v32  ;;  %v775_v0 = vsel %vm324_vm3, %v770_v57, %v774_v61  ;;  %v4724_v4 = vmax.f32 %v3917_v58, %v774_v61 }
 0x15e   :  { %v4712_v1 = vmax.f32 %v3915_v51, %v775_v0 }
 0x161   :  { %846 = vrot.lane.b32.xlu1 %v4702_v63, %s4314_s24  ;;  %848 = vrot.lane.b32.xlu0 %v4709_v33, %s4314_s24 }
 0x165   :  { %852 = vrot.lane.b32.xlu0 %v4718_v3, %s4314_s24  ;;  %850 = vrot.lane.b32.xlu1 %v4712_v1, %s4314_s24 }
 0x169   :  { %854 = vrot.lane.b32.xlu1 %v4724_v4, %s4314_s24 }
 0x1b9   :  { %v825_v6 = vpop.permute.xlu0 %824 }
 0x1bd   :  { %v827_v8 = vpop.permute.xlu0 %826 }
 0x1be   :  { %v857_v16 = vsel %vm856_vm6, %v825_v6, %v827_v8  ;;  %v882_v18 = vmax.f32 %v4623_v59, %v827_v8 }
 0x1bf   :  { %v829_v11 = vpop.permute.xlu1 %828  ;;  %v881_v23 = vmax.f32 %v4617_v54, %v857_v16 }
 0x1c0   :  { %v910_v35 = vadd.f32 %v4738_v17, %v882_v18 }
 0x1c1   :  { %v833_v19 = vpop.permute.xlu0 %832  ;;  %v909_v37 = vadd.f32 %v4743_v22, %v881_v23 }
 0x1c2   :  { %v926_v41 = vmax.f32 %v910_v35, 0.0 }
 0x1c3   :  { %v831_v21 = vpop.permute.xlu1 %830  ;;  %v925_v29 = vmax.f32 %v909_v37, 0.0 }
 0x1c4   :  { %v858_v24 = vsel %vm856_vm6, %v829_v11, %v831_v21  ;;  %v884_v25 = vmax.f32 %v4643_v13, %v831_v21 }
 0x1c5   :  { %v883_v34 = vmax.f32 %v4639_v10, %v858_v24 }
 0x1c6   :  { %v912_v26 = vadd.f32 %v4738_v17, %v884_v25  ;;  %v4102_v25 = vld [vmem:[%s5682_s3] ss:$8 sps:$4 sm:$0xff]  }
 0x1c7   :  { %v911_v59 = vadd.f32 %v4743_v22, %v883_v34  ;;  %v835_v36 = vpop.permute.xlu1 %834  ;;  %v837_v27 = vpop.permute.xlu0 %836 }
 0x1c8   :  { %v859_v38 = vsel %vm856_vm6, %v833_v19, %v835_v36  ;;  %v886_v54 = vmax.f32 %v4654_v20, %v835_v36  ;;  %v928_v39 = vmax.f32 %v912_v26, 0.0 }
 0x1c9   :  { %v885_v40 = vmax.f32 %v4647_v15, %v859_v38  ;;  %v927_v13 = vmax.f32 %v911_v59, 0.0  ;;  %v4107_v59 = vld [vmem:[%s5682_s3 + $0x14] ss:$8 sps:$4 sm:$0xff]  }
 0x1ca   :  { %v914_v44 = vadd.f32 %v4738_v17, %v886_v54  ;;  %v4759_v48 = vpack.c.bf16 %v928_v39, %v926_v41 }
 0x1cb   :  { %v839_v10 = vpop.permute.xlu1 %838  ;;  %v841_v42 = vpop.permute.xlu0 %840  ;;  %v913_v49 = vadd.f32 %v4743_v22, %v885_v40  ;;  %v4763_v51 = vpack.c.bf16 %v927_v13, %v925_v29 }
 0x1cc   :  { %v860_v46 = vsel %vm856_vm6, %v837_v27, %v839_v10  ;;  %v888_v47 = vmax.f32 %v4675_v43, %v839_v10  ;;  %v930_v56 = vmax.f32 %v914_v44, 0.0  ;;  %v1003_v61 = vrot.slane %v4759_v48, 1 }
 0x1cd   :  { %v887_v20 = vmax.f32 %v4670_v28, %v860_v46  ;;  %v929_v30 = vmax.f32 %v913_v49, 0.0  ;;  %v1000_v32 = vrot.slane %v4763_v51, 1  ;;  %v1433_v0 = vrot.slane %v4759_v48, 2  ;;  %v4105_v46 = vld [vmem:[%s5682_s3 + $0x10] ss:$8 sps:$4 sm:$0xff]  }
 0x1ce   :  { %v916_v15 = vadd.f32 %v4738_v17, %v888_v47  ;;  %v1430_v5 = vrot.slane %v4763_v51, 2  ;;  %v1679_v12 = vrot.slane %v4763_v51, 3  ;;  %v1931_v19 = vrot.slane %v4759_v48, 4 }
 0x1cf   :  { %v915_v52 = vadd.f32 %v4743_v22, %v887_v20  ;;  %v843_v53 = vpop.permute.xlu1 %842  ;;  %v845_v55 = vpop.permute.xlu0 %844  ;;  %v4110_v20 = vld [vmem:[%s5682_s3 + $0x24] ss:$8 sps:$4 sm:$0xff]  }
 0x1d0   :  { %v932_v57 = vmax.f32 %v916_v15, 0.0  ;;  %v861_v43 = vsel %vm856_vm6, %v841_v42, %v843_v53  ;;  %v890_v58 = vmax.f32 %v4689_v50, %v843_v53  ;;  %v1682_v50 = vrot.slane %v4759_v48, 3 }
 0x1d1   :  { %v931_v60 = vmax.f32 %v915_v52, 0.0  ;;  %v889_v28 = vmax.f32 %v4682_v45, %v861_v43 }
 0x1d2   :  { %v4771_v62 = vpack.c.bf16 %v932_v57, %v930_v56  ;;  %v918_v8 = vadd.f32 %v4738_v17, %v890_v58 }
 0x1d3   :  { %v4776_v6 = vpack.c.bf16 %v931_v60, %v929_v30  ;;  %v847_v11 = vpop.permute.xlu1 %846  ;;  %v917_v21 = vadd.f32 %v4743_v22, %v889_v28  ;;  %v849_v24 = vpop.permute.xlu0 %848 }
 0x1d4   :  { %v862_v45 = vsel %vm856_vm6, %v845_v55, %v847_v11  ;;  %v892_v16 = vmax.f32 %v4702_v63, %v847_v11  ;;  %v1004_v18 = vrot.slane %v4771_v62, 1  ;;  %v1434_v26 = vrot.slane %v4771_v62, 2 }
 0x1d5   :  { %v891_v23 = vmax.f32 %v4699_v31, %v862_v45  ;;  %v1001_v34 = vrot.slane %v4776_v6, 1  ;;  %v1431_v31 = vrot.slane %v4776_v6, 2  ;;  %v1683_v36 = vrot.slane %v4771_v62, 3 }
 0x1d6   :  { %v920_v63 = vadd.f32 %v4738_v17, %v892_v16  ;;  %v1005_v35 = vsel %vm324_vm3, %v1003_v61, %v1004_v18  ;;  %v934_v27 = vmax.f32 %v918_v8, 0.0  ;;  %v4803_v39 = vsel %vm600_vm1, %v1433_v0, %v1434_v26  ;;  %v4108_v0 = vld [vmem:[%s5682_s3 + $0x20] ss:$8 sps:$4 sm:$0xff]  }
 0x1d7   :  { %v919_v37 = vadd.f32 %v4743_v22, %v891_v23  ;;  %3525 = vmatprep.mubr.msk.bf16.mxu1 %vm1123_vm7, %v1005_v35  ;;  %v851_v38 = vpop.permute.xlu1 %850  ;;  %v1002_v54 = vsel %vm324_vm3, %v1000_v32, %v1001_v34  ;;  %v4808_v10 = vsel %vm600_vm1, %v1430_v5, %v1431_v31  ;;  %v933_v42 = vmax.f32 %v917_v21, 0.0  ;;  %v853_v53 = vpop.permute.xlu0 %852 }
 0x1d8   :  { %v936_v40 = vmax.f32 %v920_v63, 0.0  ;;  %v863_v13 = vsel %vm856_vm6, %v849_v24, %v851_v38  ;;  %v894_v41 = vmax.f32 %v4712_v1, %v851_v38  ;;  %1176 = vmatmul.mubr.bf16.vlgmr.msra.gmra.mrb[16].mxu1 %v1002_v54  ;;  %v4815_v47 = vsel %vm1678_vm8, %v1682_v50, %v1683_v36 }
 0x1d9   :  { %v935_v29 = vmax.f32 %v919_v37, 0.0  ;;  %v893_v44 = vmax.f32 %v4709_v33, %v863_v13  ;;  %1338 = vmatpush1.bf16.msra.mxu1 %v4102_v25  ;;  %v1680_v15 = vrot.slane %v4776_v6, 3  ;;  %v1928_v33 = vrot.slane %v4763_v51, 4  ;;  %v4114_v13 = vld [vmem:[%s5682_s3 + $0x40] ss:$8 sps:$4 sm:$0xff]  }
 0x1da   :  { %v4817_v49 = vpack.c.bf16 %v936_v40, %v934_v27  ;;  %v922_v1 = vadd.f32 %v4738_v17, %v894_v41  ;;  %1339 = vmatprep.subr.bf16.mxu1 %v4107_v59  ;;  %v1932_v57 = vrot.slane %v4771_v62, 4  ;;  %v1929_v43 = vrot.slane %v4776_v6, 4 }
 0x1db   :  { %v4825_v52 = vpack.c.bf16 %v935_v29, %v933_v42  ;;  %v921_v55 = vadd.f32 %v4743_v22, %v893_v44  ;;  %v855_v56 = vpop.permute.xlu1 %854  ;;  %v4846_v45 = vsel %vm1678_vm8, %v1679_v12, %v1680_v15 }
 0x1dc   :  { %v938_v58 = vmax.f32 %v922_v1, 0.0  ;;  %v864_v30 = vsel %vm856_vm6, %v853_v53, %v855_v56  ;;  %v896_v60 = vmax.f32 %v4724_v4, %v855_v56  ;;  %v1008_v28 = vrot.slane %v4817_v49, 1  ;;  %v4113_v4 = vld [vmem:[%s5682_s3 + $0x34] ss:$8 sps:$4 sm:$0xff]  }
 0x1dd   :  { %v937_v61 = vmax.f32 %v921_v55, 0.0  ;;  %v895_v32 = vmax.f32 %v4718_v3, %v864_v30  ;;  %1340 = vmatpush1.bf16.msra.mxu1 %v4105_v46  ;;  %v1006_v5 = vrot.slane %v4825_v52, 1  ;;  %v1438_v8 = vrot.slane %v4817_v49, 2  ;;  %v4119_v1 = vld [vmem:[%s5682_s3 + $0x54] ss:$8 sps:$4 sm:$0xff]  }
 0x1de   :  { %v924_v11 = vadd.f32 %v4738_v17, %v896_v60  ;;  %v1009_v50 = vsel %vm324_vm3, %v1004_v18, %v1008_v28  ;;  %1341 = vmatprep.subr.bf16.mxu1 %v4110_v20  ;;  %v1436_v3 = vrot.slane %v4825_v52, 2  ;;  %v1687_v18 = vrot.slane %v4817_v49, 3  ;;  %v4117_v30 = vld [vmem:[%s5682_s3 + $0x50] ss:$8 sps:$4 sm:$0xff]   ;;  %v4122_v60 = vld [vmem:[%s5682_s3 + $0x64] ss:$8 sps:$4 sm:$0xff]  }
 0x1df   :  { %v923_v16 = vadd.f32 %v4743_v22, %v895_v32  ;;  %3526 = vmatprep.mubr.msk.bf16.mxu1 %vm1123_vm7, %v1009_v50  ;;  %v1007_v21 = vsel %vm324_vm3, %v1001_v34, %v1006_v5  ;;  %v4852_v17 = vsel %vm600_vm1, %v1434_v26, %v1438_v8  ;;  %v1685_v25 = vrot.slane %v4825_v52, 3  ;;  %v4111_v34 = vld [vmem:[%s5682_s3 + $0x30] ss:$8 sps:$4 sm:$0xff]  }
 0x1e0   :  { %v940_v23 = vmax.f32 %v924_v11, 0.0  ;;  %1186 = vmatmul.mubr.bf16.gmra.mrb[20].mxu1 %v1007_v21  ;;  %v4856_v24 = vsel %vm600_vm1, %v1431_v31, %v1436_v3  ;;  %v4862_v22 = vsel %vm1927_vm9, %v1931_v19, %v1932_v57  ;;  %v4868_v26 = vsel %vm1678_vm8, %v1683_v36, %v1687_v18  ;;  %v4116_v19 = vld [vmem:[%s5682_s3 + $0x44] ss:$8 sps:$4 sm:$0xff]   ;;  %v4123_v32 = vld [vmem:[%s5682_s3 + $0x70] ss:$8 sps:$4 sm:$0xff]  }
 0x1e1   :  { %v939_v12 = vmax.f32 %v923_v16, 0.0  ;;  %1342 = vmatpush1.bf16.msra.mxu1 %v4108_v0  ;;  %v4871_v63 = vsel %vm1927_vm9, %v1928_v33, %v1929_v43  ;;  %v1936_v35 = vrot.slane %v4817_v49, 4  ;;  %v4880_v31 = vsel %vm1678_vm8, %v1680_v15, %v1685_v25  ;;  %v4128_v0 = vld [vmem:[%s5682_s3 + $0x84] ss:$8 sps:$4 sm:$0xff]   ;;  %v4129_v11 = vld [vmem:[%s5682_s3 + $0x90] ss:$8 sps:$4 sm:$0xff]  }
 0x1e2   :  { %v4874_v59 = vpack.c.bf16 %v940_v23, %v938_v58  ;;  %1343 = vmatprep.subr.bf16.mxu1 %v4113_v4  ;;  %v1934_v27 = vrot.slane %v4825_v52, 4  ;;  %v4136_v16 = vld [vmem:[%s5682_s3 + $0x154] ss:$8 sps:$4 sm:$0xff]   ;;  %v4134_v21 = vld [vmem:[%s5682_s3 + $0x150] ss:$8 sps:$4 sm:$0xff]  }
 0x1e3   :  { %v4883_v37 = vpack.c.bf16 %v939_v12, %v937_v61  ;;  %v4886_v36 = vsel %vm1927_vm9, %v1932_v57, %v1936_v35  ;;  %v4125_v61 = vld [vmem:[%s5682_s3 + $0x74] ss:$8 sps:$4 sm:$0xff]   ;;  %v4137_v23 = vld [vmem:[%s5682_s3 + $0x160] ss:$8 sps:$4 sm:$0xff]   ;;  %v4140_v12 = vld [vmem:[%s5682_s3 + $0x170] ss:$8 sps:$4 sm:$0xff]  }
 0x1e4   :  { %v1012_v38 = vrot.slane %v4874_v59, 1  ;;  %v1442_v54 = vrot.slane %v4874_v59, 2  ;;  %v4891_v40 = vsel %vm1927_vm9, %v1929_v43, %v1934_v27  ;;  %v1691_v29 = vrot.slane %v4874_v59, 3 }
 0x1e5   :  { %1344 = vmatpush1.bf16.msra.mxu1 %v4111_v34  ;;  %v1010_v41 = vrot.slane %v4883_v37, 1  ;;  %v1440_v42 = vrot.slane %v4883_v37, 2  ;;  %v1689_v44 = vrot.slane %v4883_v37, 3  ;;  %v1940_v15 = vrot.slane %v4874_v59, 4  ;;  %v4148_v34 = vld [vmem:[%s5682_s3 + $0x194] ss:$8 sps:$4 sm:$0xff]  }
 0x1e6   :  { %v1013_v46 = vsel %vm324_vm3, %v1008_v28, %v1012_v38  ;;  %1345 = vmatprep.subr.bf16.mxu1 %v4116_v19  ;;  %v4907_v20 = vsel %vm600_vm1, %v1438_v8, %v1442_v54  ;;  %v1938_v33 = vrot.slane %v4883_v37, 4  ;;  %v4921_v56 = vsel %vm1678_vm8, %v1687_v18, %v1691_v29  ;;  %v4120_v28 = vld [vmem:[%s5682_s3 + $0x60] ss:$8 sps:$4 sm:$0xff]   ;;  %v4131_v8 = vld [vmem:[%s5682_s3 + $0x94] ss:$8 sps:$4 sm:$0xff]  }
 0x1e7   :  { %3527 = vmatprep.mubr.msk.bf16.mxu1 %vm1123_vm7, %v1013_v46  ;;  %v1011_v53 = vsel %vm324_vm3, %v1006_v5, %v1010_v41  ;;  %v4916_v55 = vsel %vm600_vm1, %v1436_v3, %v1440_v42  ;;  %v4926_v57 = vsel %vm1678_vm8, %v1685_v25, %v1689_v44  ;;  %v4931_v43 = vsel %vm1927_vm9, %v1936_v35, %v1940_v15  ;;  %v4126_v5 = vld [vmem:[%s5682_s3 + $0x80] ss:$8 sps:$4 sm:$0xff]   ;;  %v4139_v18 = vld [vmem:[%s5682_s3 + $0x164] ss:$8 sps:$4 sm:$0xff]   ;;  %v4142_v25 = vld [vmem:[%s5682_s3 + $0x174] ss:$8 sps:$4 sm:$0xff]  }
 0x1e8   :  { %1196 = vmatmul.mubr.bf16.gmra.mrb[24].mxu1 %v1011_v53  ;;  %v4936_v58 = vsel %vm1927_vm9, %v1934_v27, %v1938_v33  ;;  %v4146_v35 = vld [vmem:[%s5682_s3 + $0x190] ss:$8 sps:$4 sm:$0xff]   ;;  %v4154_v19 = vld [vmem:[%s5682_s3 + $0x1b4] ss:$8 sps:$4 sm:$0xff]   ;;  %v4163_v46 = vld [vmem:[%s5682_s3 + $0x1e4] ss:$8 sps:$4 sm:$0xff]  }
 0x1e9   :  { %1346 = vmatpush1.bf16.msra.mxu1 %v4114_v13  ;;  %3528 = vmatprep.mubr.msk.bf16.mxu1 %vm1123_vm7, %v1012_v38  ;;  %v4152_v27 = vld [vmem:[%s5682_s3 + $0x1b0] ss:$8 sps:$4 sm:$0xff]   ;;  %v4155_v38 = vld [vmem:[%s5682_s3 + $0x1c0] ss:$8 sps:$4 sm:$0xff]   ;;  %v4160_v13 = vld [vmem:[%s5682_s3 + $0x1d4] ss:$8 sps:$4 sm:$0xff]  }
 0x1ea   :  { %1347 = vmatprep.subr.bf16.mxu1 %v4119_v1  ;;  %v4161_v1 = vld [vmem:[%s5682_s3 + $0x1e0] ss:$8 sps:$4 sm:$0xff]  }
 0x1ed   :  { %1348 = vmatpush1.bf16.msra.mxu1 %v4117_v30 }
 0x1ee   :  { %1349 = vmatprep.subr.bf16.mxu1 %v4122_v60 }
 0x1f0   :  { %1206 = vmatmul.mubr.bf16.gmra.mrb[28].mxu1 %v1010_v41  ;;  %v4158_v41 = vld [vmem:[%s5682_s3 + $0x1d0] ss:$8 sps:$4 sm:$0xff]  }
 0x1f1   :  { %1350 = vmatpush1.bf16.msra.mxu1 %v4120_v28  ;;  %3552 = vmatprep.mubr.msk.bf16.mxu1 %vm1123_vm7, %v4759_v48  ;;  %v969_v48 = vld [vmem:[%s5682_s3 + $0xa0] sm:$0x11] }
 0x1f2   :  { %1351 = vmatprep.subr.bf16.mxu1 %v4125_v61  ;;  %v3550_v50 = vcombine.high %v969_v48, %v969_v48  ;;  %v3549_v4 = vcombine.low %v969_v48, %v969_v48  ;;  %v4168_v28 = vld [vmem:[%s5682_s3 + $0x1fc] ss:$8 sps:$4 sm:$0xff]   ;;  %v4166_v61 = vld [vmem:[%s5682_s3 + $0x1f8] ss:$8 sps:$4 sm:$0xff]  }
 0x1f3   :  { %v4180_v48 = vld [vmem:[%s5682_s3 + $0x23c] ss:$8 sps:$4 sm:$0xff]  }
 0x1f4   :  { %v1332_v3 = vsel %vm1136_vm5, %v3549_v4, 0  ;;  %v4184_v4 = vld [vmem:[%s5682_s3 + $0x258] ss:$8 sps:$4 sm:$0xff]  }
 0x1f5   :  { %1352 = vmatpush1.bf16.msra.mxu1 %v4123_v32  ;;  %v4171_v32 = vld [vmem:[%s5682_s3 + $0x20c] ss:$8 sps:$4 sm:$0xff]  }
 0x1f6   :  { %1353 = vmatprep.subr.bf16.mxu1 %v4128_v0  ;;  %v4169_v0 = vld [vmem:[%s5682_s3 + $0x208] ss:$8 sps:$4 sm:$0xff]  }
 0x1f9   :  { %1354 = vmatpush1.bf16.msra.mxu1 %v4126_v5  ;;  %v4174_v5 = vld [vmem:[%s5682_s3 + $0x21c] ss:$8 sps:$4 sm:$0xff]  }
 0x1fa   :  { %1355 = vmatprep.subr.bf16.mxu1 %v4131_v8  ;;  %v4172_v8 = vld [vmem:[%s5682_s3 + $0x218] ss:$8 sps:$4 sm:$0xff]  }
 0x1fd   :  { %1356 = vmatpush1.bf16.msra.mxu1 %v4129_v11  ;;  %v4178_v11 = vld [vmem:[%s5682_s3 + $0x238] ss:$8 sps:$4 sm:$0xff]  }
 0x1fe   :  { %3551 = vmatprep.subr.msk.bf16.mxu1 %vm1136_vm5, %v3550_v50  ;;  %v4186_v50 = vld [vmem:[%s5682_s3 + $0x25c] ss:$8 sps:$4 sm:$0xff]  }
 0x201   :  { %1358 = vmatpush1.bf16.msra.mxu1 %v1332_v3  ;;  %v4192_v3 = vld [vmem:[%s5682_s3 + $0x27c] ss:$8 sps:$4 sm:$0xff]  }
 0x202   :  { %1571 = vmatprep.subr.bf16.mxu1 %v4136_v16  ;;  %v4190_v16 = vld [vmem:[%s5682_s3 + $0x278] ss:$8 sps:$4 sm:$0xff]  }
 0x204   :  { %1370 = vmatmul.mubr.bf16.vlgmr.msra.gmra.mrb[16].mxu1 %v4763_v51  ;;  %v4145_v51 = vld [vmem:[%s5682_s3 + $0x184] ss:$8 sps:$4 sm:$0xff]  }
 0x205   :  { %3553 = vmatprep.mubr.msk.bf16.mxu1 %vm1123_vm7, %v4771_v62  ;;  %1572 = vmatpush1.bf16.msra.mxu1 %v4134_v21  ;;  %v4143_v62 = vld [vmem:[%s5682_s3 + $0x180] ss:$8 sps:$4 sm:$0xff]  }
 0x206   :  { %1573 = vmatprep.subr.bf16.mxu1 %v4139_v18  ;;  %v4193_v21 = vld [vmem:[%s5682_s3 + $0x288] ss:$8 sps:$4 sm:$0xff]  }
 0x209   :  { %1574 = vmatpush1.bf16.msra.mxu1 %v4137_v23 }
 0x20a   :  { %1575 = vmatprep.subr.bf16.mxu1 %v4142_v25 }
 0x20c   :  { %1380 = vmatmul.mubr.bf16.gmra.mrb[20].mxu1 %v4776_v6  ;;  %v4151_v6 = vld [vmem:[%s5682_s3 + $0x1a4] ss:$8 sps:$4 sm:$0xff]  }
 0x20d   :  { %3554 = vmatprep.mubr.msk.bf16.mxu1 %vm1123_vm7, %v4817_v49  ;;  %1576 = vmatpush1.bf16.msra.mxu1 %v4140_v12  ;;  %v4149_v49 = vld [vmem:[%s5682_s3 + $0x1a0] ss:$8 sps:$4 sm:$0xff]   ;;  %v4200_v12 = vld [vmem:[%s5682_s3 + $0x2a4] ss:$8 sps:$4 sm:$0xff]  }
 0x20e   :  { %1577 = vmatprep.subr.bf16.mxu1 %v4145_v51  ;;  %v4198_v51 = vld [vmem:[%s5682_s3 + $0x2a0] ss:$8 sps:$4 sm:$0xff]  }
 0x211   :  { %1578 = vmatpush1.bf16.msra.mxu1 %v4143_v62  ;;  %v4203_v62 = vld [vmem:[%s5682_s3 + $0x2b4] ss:$8 sps:$4 sm:$0xff]  }
 0x212   :  { %1579 = vmatprep.subr.bf16.mxu1 %v4148_v34  ;;  %v4201_v34 = vld [vmem:[%s5682_s3 + $0x2b0] ss:$8 sps:$4 sm:$0xff]  }
 0x214   :  { %1390 = vmatmul.mubr.bf16.gmra.mrb[24].mxu1 %v4825_v52  ;;  %v4157_v52 = vld [vmem:[%s5682_s3 + $0x1c4] ss:$8 sps:$4 sm:$0xff]  }
 0x215   :  { %3555 = vmatprep.mubr.msk.bf16.mxu1 %vm1123_vm7, %v4874_v59  ;;  %1580 = vmatpush1.bf16.msra.mxu1 %v4146_v35  ;;  %v4206_v35 = vld [vmem:[%s5682_s3 + $0x2c4] ss:$8 sps:$4 sm:$0xff]  }
 0x216   :  { %1581 = vmatprep.subr.bf16.mxu1 %v4151_v6  ;;  %v4204_v6 = vld [vmem:[%s5682_s3 + $0x2c0] ss:$8 sps:$4 sm:$0xff]  }
 0x219   :  { %1582 = vmatpush1.bf16.msra.mxu1 %v4149_v49  ;;  %v4212_v49 = vld [vmem:[%s5682_s3 + $0x2e4] ss:$8 sps:$4 sm:$0xff]  }
 0x21a   :  { %1583 = vmatprep.subr.bf16.mxu1 %v4154_v19  ;;  %v4210_v19 = vld [vmem:[%s5682_s3 + $0x2e0] ss:$8 sps:$4 sm:$0xff]  }
 0x21c   :  { %1400 = vmatmul.mubr.bf16.gmra.mrb[28].mxu1 %v4883_v37 }
 0x21d   :  { %1584 = vmatpush1.bf16.msra.mxu1 %v4152_v27  ;;  %3600 = vmatprep.mubr.msk.bf16.mxu1 %vm1123_vm7, %v4803_v39  ;;  %v3576_v39 = vld [vmem:[%s5682_s3 + $0x1f0] sm:$0x11]  ;;  %v4218_v27 = vld [vmem:[%s5682_s3 + $0x304] ss:$8 sps:$4 sm:$0xff]  }
 0x21e   :  { %1585 = vmatprep.subr.bf16.mxu1 %v4157_v52  ;;  %v3598_v53 = vcombine.high %v3576_v39, %v3576_v39  ;;  %v3597_v30 = vcombine.low %v3576_v39, %v3576_v39  ;;  %v4216_v52 = vld [vmem:[%s5682_s3 + $0x300] ss:$8 sps:$4 sm:$0xff]  }
 0x220   :  { %v1566_v60 = vsel %vm1136_vm5, %v3597_v30, 0 }
 0x221   :  { %1586 = vmatpush1.bf16.msra.mxu1 %v4155_v38  ;;  %v4224_v38 = vld [vmem:[%s5682_s3 + $0x324] ss:$8 sps:$4 sm:$0xff]  }
 0x222   :  { %1587 = vmatprep.subr.bf16.mxu1 %v4160_v13  ;;  %v4222_v13 = vld [vmem:[%s5682_s3 + $0x320] ss:$8 sps:$4 sm:$0xff]  }
 0x225   :  { %1588 = vmatpush1.bf16.msra.mxu1 %v4158_v41  ;;  %v4225_v41 = vld [vmem:[%s5682_s3 + $0x330] ss:$8 sps:$4 sm:$0xff]  }
 0x226   :  { %1589 = vmatprep.subr.bf16.mxu1 %v4163_v46 }
 0x229   :  { %1590 = vmatpush1.bf16.msra.mxu1 %v4161_v1 }
 0x22a   :  { %3599 = vmatprep.subr.msk.bf16.mxu1 %vm1136_vm5, %v3598_v53 }
 0x22d   :  { %1592 = vmatpush1.bf16.msra.mxu1 %v1566_v60 }
 0x22e   :  { %1820 = vmatprep.subr.bf16.mxu1 %v4168_v28 }
 0x230   :  { %1604 = vmatmul.mubr.bf16.vlgmr.msra.gmra.mrb[16].mxu1 %v4808_v10  ;;  %v4177_v10 = vld [vmem:[%s5682_s3 + $0x22c] ss:$8 sps:$4 sm:$0xff]  }
 0x231   :  { %3601 = vmatprep.mubr.msk.bf16.mxu1 %vm1123_vm7, %v4852_v17  ;;  %1821 = vmatpush1.bf16.msra.mxu1 %v4166_v61  ;;  %v4175_v17 = vld [vmem:[%s5682_s3 + $0x228] ss:$8 sps:$4 sm:$0xff]  }
 0x232   :  { %1822 = vmatprep.subr.bf16.mxu1 %v4171_v32 }
 0x235   :  { %1823 = vmatpush1.bf16.msra.mxu1 %v4169_v0 }
 0x236   :  { %1824 = vmatprep.subr.bf16.mxu1 %v4174_v5 }
 0x238   :  { %1614 = vmatmul.mubr.bf16.gmra.mrb[20].mxu1 %v4856_v24  ;;  %v4183_v24 = vld [vmem:[%s5682_s3 + $0x24c] ss:$8 sps:$4 sm:$0xff]  }
 0x239   :  { %3602 = vmatprep.mubr.msk.bf16.mxu1 %vm1123_vm7, %v4907_v20  ;;  %1825 = vmatpush1.bf16.msra.mxu1 %v4172_v8  ;;  %v4181_v20 = vld [vmem:[%s5682_s3 + $0x248] ss:$8 sps:$4 sm:$0xff]  }
 0x23a   :  { %1826 = vmatprep.subr.bf16.mxu1 %v4177_v10 }
 0x23d   :  { %1827 = vmatpush1.bf16.msra.mxu1 %v4175_v17 }
 0x23e   :  { %1828 = vmatprep.subr.bf16.mxu1 %v4180_v48 }
 0x240   :  { %1624 = vmatmul.mubr.bf16.gmra.mrb[24].mxu1 %v4916_v55  ;;  %v4187_v55 = vld [vmem:[%s5682_s3 + $0x268] ss:$8 sps:$4 sm:$0xff]  }
 0x241   :  { %3603 = vmatprep.mubr.msk.bf16.mxu1 %vm1123_vm7, %v1442_v54  ;;  %1829 = vmatpush1.bf16.msra.mxu1 %v4178_v11  ;;  %v4189_v54 = vld [vmem:[%s5682_s3 + $0x26c] ss:$8 sps:$4 sm:$0xff]  }
 0x242   :  { %1830 = vmatprep.subr.bf16.mxu1 %v4183_v24 }
 0x245   :  { %1831 = vmatpush1.bf16.msra.mxu1 %v4181_v20 }
 0x246   :  { %1832 = vmatprep.subr.bf16.mxu1 %v4186_v50 }
 0x248   :  { %1634 = vmatmul.mubr.bf16.gmra.mrb[28].mxu1 %v1440_v42  ;;  %v4195_v42 = vld [vmem:[%s5682_s3 + $0x28c] ss:$8 sps:$4 sm:$0xff]  }
 0x249   :  { %1833 = vmatpush1.bf16.msra.mxu1 %v4184_v4  ;;  %3648 = vmatprep.mubr.msk.bf16.mxu1 %vm1123_vm7, %v4815_v47  ;;  %v3624_v47 = vld [vmem:[%s5682_s3 + $0x298] sm:$0x11] }
 0x24a   :  { %1834 = vmatprep.subr.bf16.mxu1 %v4189_v54  ;;  %v3646_v18 = vcombine.high %v3624_v47, %v3624_v47  ;;  %v3645_v23 = vcombine.low %v3624_v47, %v3624_v47 }
 0x24c   :  { %v1815_v25 = vsel %vm1136_vm5, %v3645_v23, 0 }
 0x24d   :  { %1835 = vmatpush1.bf16.msra.mxu1 %v4187_v55 }
 0x24e   :  { %1836 = vmatprep.subr.bf16.mxu1 %v4192_v3 }
 0x251   :  { %1837 = vmatpush1.bf16.msra.mxu1 %v4190_v16 }
 0x252   :  { %1838 = vmatprep.subr.bf16.mxu1 %v4195_v42 }
 0x255   :  { %1839 = vmatpush1.bf16.msra.mxu1 %v4193_v21 }
 0x256   :  { %3647 = vmatprep.subr.msk.bf16.mxu1 %vm1136_vm5, %v3646_v18 }
 0x259   :  { %1841 = vmatpush1.bf16.msra.mxu1 %v1815_v25 }
 0x25a   :  { %2069 = vmatprep.subr.bf16.mxu1 %v4200_v12 }
 0x25c   :  { %1853 = vmatmul.mubr.bf16.vlgmr.msra.gmra.mrb[16].mxu1 %v4846_v45  ;;  %v4209_v45 = vld [vmem:[%s5682_s3 + $0x2d4] ss:$8 sps:$4 sm:$0xff]  }
 0x25d   :  { %3649 = vmatprep.mubr.msk.bf16.mxu1 %vm1123_vm7, %v4868_v26  ;;  %2070 = vmatpush1.bf16.msra.mxu1 %v4198_v51  ;;  %v4207_v26 = vld [vmem:[%s5682_s3 + $0x2d0] ss:$8 sps:$4 sm:$0xff]  }
 0x25e   :  { %2071 = vmatprep.subr.bf16.mxu1 %v4203_v62 }
 0x261   :  { %2072 = vmatpush1.bf16.msra.mxu1 %v4201_v34 }
 0x262   :  { %2073 = vmatprep.subr.bf16.mxu1 %v4206_v35 }
 0x264   :  { %1863 = vmatmul.mubr.bf16.gmra.mrb[20].mxu1 %v4880_v31  ;;  %v4215_v31 = vld [vmem:[%s5682_s3 + $0x2f4] ss:$8 sps:$4 sm:$0xff]  }
 0x265   :  { %3650 = vmatprep.mubr.msk.bf16.mxu1 %vm1123_vm7, %v4921_v56  ;;  %2074 = vmatpush1.bf16.msra.mxu1 %v4204_v6  ;;  %v4213_v56 = vld [vmem:[%s5682_s3 + $0x2f0] ss:$8 sps:$4 sm:$0xff]  }
 0x266   :  { %2075 = vmatprep.subr.bf16.mxu1 %v4209_v45 }
 0x269   :  { %2076 = vmatpush1.bf16.msra.mxu1 %v4207_v26 }
 0x26a   :  { %2077 = vmatprep.subr.bf16.mxu1 %v4212_v49 }
 0x26c   :  { %1873 = vmatmul.mubr.bf16.gmra.mrb[24].mxu1 %v4926_v57  ;;  %v4219_v57 = vld [vmem:[%s5682_s3 + $0x310] ss:$8 sps:$4 sm:$0xff]  }
 0x26d   :  { %3651 = vmatprep.mubr.msk.bf16.mxu1 %vm1123_vm7, %v1691_v29  ;;  %2078 = vmatpush1.bf16.msra.mxu1 %v4210_v19  ;;  %v4221_v29 = vld [vmem:[%s5682_s3 + $0x314] ss:$8 sps:$4 sm:$0xff]  }
 0x26e   :  { %2079 = vmatprep.subr.bf16.mxu1 %v4215_v31 }
 0x271   :  { %2080 = vmatpush1.bf16.msra.mxu1 %v4213_v56 }
 0x272   :  { %2081 = vmatprep.subr.bf16.mxu1 %v4218_v27 }
 0x274   :  { %1883 = vmatmul.mubr.bf16.gmra.mrb[28].mxu1 %v1689_v44  ;;  %v4227_v44 = vld [vmem:[%s5682_s3 + $0x334] ss:$8 sps:$4 sm:$0xff]  }
 0x275   :  { %2082 = vmatpush1.bf16.msra.mxu1 %v4216_v52  ;;  %3696 = vmatprep.mubr.msk.bf16.mxu1 %vm1123_vm7, %v4862_v22  ;;  %v3672_v22 = vld [vmem:[%s5682_s3 + $0x340] sm:$0x11]  ;;  %s4315_s3 = smov 112  }
 0x276   :  { %2083 = vmatprep.subr.bf16.mxu1 %v4221_v29  ;;  %v3694_v46 = vcombine.high %v3672_v22, %v3672_v22  ;;  %v3693_v39 = vcombine.low %v3672_v22, %v3672_v22 }
 0x278   :  { %v2064_v1 = vsel %vm1136_vm5, %v3693_v39, 0 }
 0x279   :  { %2084 = vmatpush1.bf16.msra.mxu1 %v4219_v57 }
 0x27a   :  { %2085 = vmatprep.subr.bf16.mxu1 %v4224_v38 }
 0x27d   :  { %2086 = vmatpush1.bf16.msra.mxu1 %v4222_v13 }
 0x27e   :  { %2087 = vmatprep.subr.bf16.mxu1 %v4227_v44 }
 0x281   :  { %2088 = vmatpush1.bf16.msra.mxu1 %v4225_v41 }
 0x282   :  { %3695 = vmatprep.subr.msk.bf16.mxu1 %vm1136_vm5, %v3694_v46  ;;  %v2301_v46 = vld [vmem:[%s5683_s4] sm:$0x3] }
 0x285   :  { %2090 = vmatpush1.bf16.msra.mxu1 %v2064_v1 }
 0x288   :  { %2102 = vmatmul.mubr.bf16.vlgmr.msra.gmra.mrb[16].mxu1 %v4871_v63 }
 0x289   :  { %3697 = vmatprep.mubr.msk.bf16.mxu1 %vm1123_vm7, %v4886_v36 }
 0x290   :  { %2112 = vmatmul.mubr.bf16.gmra.mrb[20].mxu1 %v4891_v40 }
 0x291   :  { %3698 = vmatprep.mubr.msk.bf16.mxu1 %vm1123_vm7, %v4931_v43 }
 0x298   :  { %2122 = vmatmul.mubr.bf16.gmra.mrb[24].mxu1 %v4936_v58 }
 0x299   :  { %3699 = vmatprep.mubr.msk.bf16.mxu1 %vm1123_vm7, %v1940_v15 }
 0x2a0   :  { %2132 = vmatmul.mubr.bf16.gmra.mrb[28].mxu1 %v1938_v33 }
 0x2a1   :  { %2722 = vmatprep.mubr.bf16.mxu1 %v4313_v2 }
 0x35b   :  { %v2103_v63 = vpop.f32.mrb[16].mxu1 }
 0x35c   :  { %v2105_v53 = vpop.f32.mrb[17].mxu1  ;;  %v2169_v36 = vrot.slane %v2103_v63, 2 }
 0x35d   :  { %v2107_v30 = vpop.f32.mrb[18].mxu1  ;;  %v2172_v28 = vrot.slane %v2105_v53, 2 }
 0x35e   :  { %v2170_v60 = vrot.slane %v2107_v30, 2  ;;  %v2109_v40 = vpop.f32.mrb[19].mxu1 }
 0x35f   :  { %v2173_v61 = vrot.slane %v2109_v40, 2 }
 0x360   :  { %v2171_v43 = vsel %vm600_vm1, %v2169_v36, %v2170_v60 }
 0x361   :  { %v5222_v58 = vmax.f32 %v2103_v63, %v2171_v43  ;;  %v2174_v59 = vsel %vm600_vm1, %v2172_v28, %v2173_v61  ;;  %v5292_v63 = vrot.slane %v2301_v46, %v905_v9 }
 0x362   :  { %v5225_v15 = vmax.f32 %v2105_v53, %v2174_v59 }
 0x363   :  { %2237 = vrot.lane.b32.xlu0 %v5222_v58, %s4315_s3  ;;  %v2113_v37 = vpop.f32.mrb[20].mxu1 }
 0x364   :  { %v2175_v33 = vrot.slane %v2113_v37, 2  ;;  %2239 = vrot.lane.b32.xlu1 %v5225_v15, %s4315_s3  ;;  %v2115_v32 = vpop.f32.mrb[21].mxu1 }
 0x365   :  { %v2177_v0 = vrot.slane %v2115_v32, 2  ;;  %v2117_v5 = vpop.f32.mrb[22].mxu1 }
 0x366   :  { %v2179_v8 = vrot.slane %v2117_v5, 2  ;;  %v2119_v10 = vpop.f32.mrb[23].mxu1  ;;  %v2176_v17 = vsel %vm600_vm1, %v2170_v60, %v2175_v33 }
 0x367   :  { %v2181_v48 = vrot.slane %v2119_v10, 2  ;;  %v5232_v11 = vmax.f32 %v2107_v30, %v2176_v17  ;;  %v2178_v24 = vsel %vm600_vm1, %v2173_v61, %v2177_v0  ;;  %v5297_v30 = vrot.slane %v2301_v46, %v901_v14 }
 0x368   :  { %v2212_v20 = vmax.f32 %v2109_v40, %v2178_v24  ;;  %v2180_v50 = vsel %vm600_vm1, %v2175_v33, %v2179_v8 }
 0x369   :  { %2241 = vrot.lane.b32.xlu0 %v5232_v11, %s4315_s3  ;;  %v5238_v4 = vmax.f32 %v2113_v37, %v2180_v50  ;;  %v2182_v54 = vsel %vm600_vm1, %v2177_v0, %v2181_v48 }
 0x36a   :  { %2243 = vrot.lane.b32.xlu1 %v2212_v20, %s4315_s3  ;;  %v5242_v55 = vmax.f32 %v2115_v32, %v2182_v54 }
 0x36b   :  { %v2123_v3 = vpop.f32.mrb[24].mxu1 }
 0x36c   :  { %v2183_v16 = vrot.slane %v2123_v3, 2  ;;  %v2125_v42 = vpop.f32.mrb[25].mxu1 }
 0x36d   :  { %v2185_v47 = vrot.slane %v2125_v42, 2  ;;  %2245 = vrot.lane.b32.xlu0 %v5238_v4, %s4315_s3  ;;  %v2127_v21 = vpop.f32.mrb[26].mxu1 }
 0x36e   :  { %v2187_v18 = vrot.slane %v2127_v21, 2  ;;  %2247 = vrot.lane.b32.xlu1 %v5242_v55, %s4315_s3  ;;  %v2129_v23 = vpop.f32.mrb[27].mxu1  ;;  %v2184_v25 = vsel %vm600_vm1, %v2179_v8, %v2183_v16 }
 0x36f   :  { %v2189_v12 = vrot.slane %v2129_v23, 2  ;;  %v5249_v51 = vmax.f32 %v2117_v5, %v2184_v25  ;;  %v2186_v62 = vsel %vm600_vm1, %v2181_v48, %v2185_v47 }
 0x370   :  { %v5252_v34 = vmax.f32 %v2119_v10, %v2186_v62  ;;  %v2188_v35 = vsel %vm600_vm1, %v2183_v16, %v2187_v18 }
 0x371   :  { %2249 = vrot.lane.b32.xlu0 %v5249_v51, %s4315_s3  ;;  %v5257_v6 = vmax.f32 %v2123_v3, %v2188_v35  ;;  %v2190_v45 = vsel %vm600_vm1, %v2185_v47, %v2189_v12 }
 0x372   :  { %2251 = vrot.lane.b32.xlu1 %v5252_v34, %s4315_s3  ;;  %v5262_v26 = vmax.f32 %v2125_v42, %v2190_v45 }
 0x373   :  { %v2133_v49 = vpop.f32.mrb[28].mxu1 }
 0x374   :  { %v2191_v19 = vrot.slane %v2133_v49, 2  ;;  %v2135_v31 = vpop.f32.mrb[29].mxu1 }
 0x375   :  { %v2193_v56 = vrot.slane %v2135_v31, 2  ;;  %2253 = vrot.lane.b32.xlu0 %v5257_v6, %s4315_s3  ;;  %v2137_v27 = vpop.f32.mrb[30].mxu1 }
 0x376   :  { %2255 = vrot.lane.b32.xlu1 %v5262_v26, %s4315_s3  ;;  %v2138_v52 = vpop.f32.mrb[31].mxu1  ;;  %v2192_v29 = vsel %vm600_vm1, %v2187_v18, %v2191_v19  ;;  %v5278_v44 = vmax.f32 %v2133_v49, %v2191_v19 }
 0x377   :  { %v5269_v57 = vmax.f32 %v2127_v21, %v2192_v29  ;;  %v2194_v38 = vsel %vm600_vm1, %v2189_v12, %v2193_v56  ;;  %v5280_v22 = vmax.f32 %v2135_v31, %v2193_v56 }
 0x378   :  { %v5272_v13 = vmax.f32 %v2129_v23, %v2194_v38 }
 0x379   :  { %2257 = vrot.lane.b32.xlu0 %v5269_v57, %s4315_s3 }
 0x37a   :  { %2259 = vrot.lane.b32.xlu1 %v5272_v13, %s4315_s3 }
 0x37d   :  { %2261 = vrot.lane.b32.xlu0 %v5278_v44, %s4315_s3 }
 0x37e   :  { %2263 = vrot.lane.b32.xlu1 %v5280_v22, %s4315_s3 }
 0x3d5   :  { %v2238_v41 = vpop.permute.xlu0 %2237 }
 0x3d6   :  { %v2240_v39 = vpop.permute.xlu1 %2239 }
 0x3d7   :  { %v2266_v1 = vsel %vm2265_vm10, %v2238_v41, %v2240_v39  ;;  %v2288_v53 = vmax.f32 %v5225_v15, %v2240_v39 }
 0x3d8   :  { %v2287_v36 = vmax.f32 %v5222_v58, %v2266_v1 }
 0x3d9   :  { %v2314_v28 = vadd.f32 %v5292_v63, %v2288_v53 }
 0x3da   :  { %v2313_v59 = vadd.f32 %v5297_v30, %v2287_v36 }
 0x3db   :  { %v2242_v60 = vpop.permute.xlu0 %2241  ;;  %v2328_v33 = vmax.f32 %v2314_v28, 0.0 }
 0x3dc   :  { %v2244_v40 = vpop.permute.xlu1 %2243  ;;  %v2327_v5 = vmax.f32 %v2313_v59, 0.0 }
 0x3dd   :  { %v2267_v61 = vsel %vm2265_vm10, %v2242_v60, %v2244_v40  ;;  %v2290_v43 = vmax.f32 %v2212_v20, %v2244_v40 }
 0x3de   :  { %v2289_v9 = vmax.f32 %v5232_v11, %v2267_v61 }
 0x3df   :  { %v2316_v37 = vadd.f32 %v5292_v63, %v2290_v43  ;;  %v2246_v15 = vpop.permute.xlu0 %2245 }
 0x3e0   :  { %v2315_v7 = vadd.f32 %v5297_v30, %v2289_v9  ;;  %v2248_v14 = vpop.permute.xlu1 %2247 }
 0x3e1   :  { %v2330_v32 = vmax.f32 %v2316_v37, 0.0  ;;  %v2268_v58 = vsel %vm2265_vm10, %v2246_v15, %v2248_v14  ;;  %v2292_v0 = vmax.f32 %v5242_v55, %v2248_v14  ;;  %v2349_v37 = vld [vmem:[%s5684_s5] sm:$0x1]  ;;  %v4230_v15 = vld [vmem:[%s5685_s6 + $0x90] sm:$0xff]  }
 0x3e2   :  { %v2329_v8 = vmax.f32 %v2315_v7, 0.0  ;;  %v2291_v10 = vmax.f32 %v5238_v4, %v2268_v58  ;;  %v4231_v7 = vld [vmem:[%s5685_s6 + $0x98] sm:$0xff]   ;;  %v4232_v14 = vld [vmem:[%s5685_s6 + $0xa0] sm:$0xff]   ;;  %v4234_v58 = vld [vmem:[%s5685_s6 + $0xb0] sm:$0xff]  }
 0x3e3   :  { %v5309_v17 = vpack.c.bf16 %v2330_v32, %v2328_v33  ;;  %v2250_v48 = vpop.permute.xlu0 %2249  ;;  %v2318_v20 = vadd.f32 %v5292_v63, %v2292_v0  ;;  %v4233_v33 = vld [vmem:[%s5685_s6 + $0xa8] sm:$0xff]   ;;  %v3701_v32 = vld [vmem:[%s5684_s5 + $0x1] sm:$0x1] }
 0x3e4   :  { %v5311_v11 = vpack.c.bf16 %v2329_v8, %v2327_v5  ;;  %v2252_v24 = vpop.permute.xlu1 %2251  ;;  %v2317_v55 = vadd.f32 %v5297_v30, %v2291_v10  ;;  %v4239_v0 = vld [vmem:[%s5685_s6 + $0x48] sm:$0xff]   ;;  %v4235_v5 = vld [vmem:[%s5685_s6 + $0xb8] sm:$0xff]   ;;  %v4240_v8 = vld [vmem:[%s5685_s6 + $0x50] sm:$0xff]  }
 0x3e5   :  { %v2269_v50 = vsel %vm2265_vm10, %v2250_v48, %v2252_v24  ;;  %v2294_v54 = vmax.f32 %v5252_v34, %v2252_v24  ;;  %2362 = vmatprep.subr.bf16.mxu0 %v5309_v17  ;;  %2690 = vmatprep.subr.bf16.mxu1 %v5309_v17  ;;  %v2332_v21 = vmax.f32 %v2318_v20, 0.0  ;;  %v4236_v10 = vld [vmem:[%s5685_s6 + $0xc0] sm:$0xff]   ;;  %v4241_v48 = vld [vmem:[%s5685_s6 + $0x58] sm:$0xff]   ;;  %v4237_v24 = vld [vmem:[%s5685_s6 + $0xc8] sm:$0xff]  }
 0x3e6   :  { %v2293_v4 = vmax.f32 %v5249_v51, %v2269_v50  ;;  %2363 = vmatpush1.bf16.msra.mxu0 %v5311_v11  ;;  %2691 = vmatpush1.bf16.msra.mxu1 %v5311_v11  ;;  %v2331_v12 = vmax.f32 %v2317_v55, 0.0  ;;  %v4242_v20 = vld [vmem:[%s5685_s6 + $0x60] sm:$0xff]   ;;  %v4238_v50 = vld [vmem:[%s5685_s6 + $0xd0] sm:$0xff]  }
 0x3e7   :  { %v2320_v3 = vadd.f32 %v5292_v63, %v2294_v54  ;;  %v2254_v16 = vpop.permute.xlu0 %2253  ;;  %v4243_v54 = vld [vmem:[%s5685_s6 + $0x68] sm:$0xff]   ;;  %v4244_v55 = vld [vmem:[%s5685_s6 + $0x70] sm:$0xff]  }
 0x3e8   :  { %v2319_v42 = vadd.f32 %v5297_v30, %v2293_v4  ;;  %v2256_v47 = vpop.permute.xlu1 %2255  ;;  %v4245_v4 = vld [vmem:[%s5685_s6 + $0x78] sm:$0xff]  }
 0x3e9   :  { %v2334_v18 = vmax.f32 %v2320_v3, 0.0  ;;  %v2270_v23 = vsel %vm2265_vm10, %v2254_v16, %v2256_v47  ;;  %v2296_v25 = vmax.f32 %v5262_v26, %v2256_v47  ;;  %v4246_v3 = vld [vmem:[%s5685_s6 + $0x80] sm:$0xff]   ;;  %v4247_v16 = vld [vmem:[%s5685_s6 + $0x88] sm:$0xff]  }
 0x3ea   :  { %v2333_v62 = vmax.f32 %v2319_v42, 0.0  ;;  %v2295_v51 = vmax.f32 %v5257_v6, %v2270_v23 }
 0x3eb   :  { %v5327_v34 = vpack.c.bf16 %v2334_v18, %v2332_v21  ;;  %v2258_v35 = vpop.permute.xlu0 %2257  ;;  %v2322_v19 = vadd.f32 %v5292_v63, %v2296_v25 }
 0x3ec   :  { %v5329_v45 = vpack.c.bf16 %v2333_v62, %v2331_v12  ;;  %v2260_v49 = vpop.permute.xlu1 %2259  ;;  %v2321_v26 = vadd.f32 %v5297_v30, %v2295_v51 }
 0x3ed   :  { %v2271_v31 = vsel %vm2265_vm10, %v2258_v35, %v2260_v49  ;;  %v2298_v56 = vmax.f32 %v5272_v13, %v2260_v49  ;;  %2364 = vmatprep.subr.bf16.mxu0 %v5327_v34  ;;  %2692 = vmatprep.subr.bf16.mxu1 %v5327_v34  ;;  %v2336_v41 = vmax.f32 %v2322_v19, 0.0 }
 0x3ee   :  { %v2297_v6 = vmax.f32 %v5269_v57, %v2271_v31  ;;  %2365 = vmatpush1.bf16.msra.mxu0 %v5329_v45  ;;  %2693 = vmatpush1.bf16.msra.mxu1 %v5329_v45  ;;  %v2335_v1 = vmax.f32 %v2321_v26, 0.0  ;;  %v4248_v26 = vld [vmem:[%s5685_s6] sm:$0xff]  }
 0x3ef   :  { %v2324_v27 = vadd.f32 %v5292_v63, %v2298_v56  ;;  %v2262_v52 = vpop.permute.xlu0 %2261 }
 0x3f0   :  { %v2323_v29 = vadd.f32 %v5297_v30, %v2297_v6  ;;  %v2264_v38 = vpop.permute.xlu1 %2263  ;;  %v3801_v6 = vld [vmem:[%s5684_s5 + $0x4] sm:$0x1] }
 0x3f1   :  { %v2338_v13 = vmax.f32 %v2324_v27, 0.0  ;;  %v2272_v46 = vsel %vm2265_vm10, %v2262_v52, %v2264_v38  ;;  %v2300_v39 = vmax.f32 %v5280_v22, %v2264_v38  ;;  %v2355_v22 = vsel %vm1136_vm5, 65535, %v4313_v2  ;;  %v4249_v38 = vld [vmem:[%s5685_s6 + $0x8] sm:$0xff]  }
 0x3f2   :  { %v2337_v53 = vmax.f32 %v2323_v29, 0.0  ;;  %v2299_v57 = vmax.f32 %v5278_v44, %v2272_v46  ;;  %v4252_v46 = vld [vmem:[%s5685_s6 + $0x20] sm:$0xff]  }
 0x3f3   :  { %v5345_v36 = vpack.c.bf16 %v2338_v13, %v2336_v41  ;;  %v2326_v60 = vadd.f32 %v5292_v63, %v2300_v39  ;;  %v4250_v41 = vld [vmem:[%s5685_s6 + $0x10] sm:$0xff]   ;;  %v4251_v13 = vld [vmem:[%s5685_s6 + $0x18] sm:$0xff]   ;;  %v4253_v39 = vld [vmem:[%s5685_s6 + $0x28] sm:$0xff]  }
 0x3f4   :  { %v5348_v40 = vpack.c.bf16 %v2337_v53, %v2335_v1  ;;  %v2325_v28 = vadd.f32 %v5297_v30, %v2299_v57  ;;  %v3741_v30 = vld [vmem:[%s5684_s5 + $0x2] sm:$0x1]  ;;  %v4254_v1 = vld [vmem:[%s5685_s6 + $0x30] sm:$0xff]   ;;  %v4255_v53 = vld [vmem:[%s5685_s6 + $0x38] sm:$0xff]  }
 0x3f5   :  { %v2340_v61 = vmax.f32 %v2326_v60, 0.0  ;;  %2366 = vmatprep.subr.bf16.mxu0 %v5345_v36  ;;  %2694 = vmatprep.subr.bf16.mxu1 %v5345_v36  ;;  %v4256_v57 = vld [vmem:[%s5685_s6 + $0x40] sm:$0xff]  }
 0x3f6   :  { %v2339_v43 = vmax.f32 %v2325_v28, 0.0  ;;  %2367 = vmatpush1.bf16.msra.mxu0 %v5348_v40  ;;  %2695 = vmatpush1.bf16.msra.mxu1 %v5348_v40  ;;  %v4262_v28 = vld [vmem:[%s5685_s6 + $0x130] sm:$0xff]  }
 0x3f7   :  { %v2348_v44 = vpack.c.bf16 %v2340_v61, %v2340_v61  ;;  %v4263_v61 = vld [vmem:[%s5685_s6 + $0xf0] sm:$0xff]  }
 0x3f8   :  { %v2347_v59 = vpack.c.bf16 %v2339_v43, %v2339_v43  ;;  %v4265_v43 = vld [vmem:[%s5685_s6 + $0xf8] sm:$0xff]  }
 0x3f9   :  { %v5357_v63 = vand.u32 %v2355_v22, %v2348_v44  ;;  %v4266_v44 = vld [vmem:[%s5685_s6 + $0x140] sm:$0xff]  }
 0x3fa   :  { %v5359_v9 = vand.u32 %v2355_v22, %v2347_v59  ;;  %v4264_v22 = vld [vmem:[%s5685_s6 + $0x138] sm:$0xff]   ;;  %v4267_v59 = vld [vmem:[%s5685_s6 + $0x100] sm:$0xff]  }
 0x3fb   :  { %2368 = vmatprep.subr.bf16.mxu0 %v5357_v63  ;;  %2696 = vmatprep.subr.bf16.mxu1 %v5357_v63 }
 0x3fc   :  { %2369 = vmatpush1.bf16.msra.mxu0 %v5359_v9  ;;  %2697 = vmatpush1.bf16.msra.mxu1 %v5359_v9 }
 0x3fd   :  { %2428 = vmatprep.subr.bf16.mxu0 %v5309_v17  ;;  %2809 = vmatprep.subr.bf16.mxu1 %v4313_v2 }
 0x3ff   :  { %3742 = vmatmul.mubr.msk.bf16.vlgmr.msra.gmra.mrb[32].mxu1 %vm2350_vm11, %v3741_v30  ;;  %3700 = vmatmul.mubr.msk.bf16.vlgmr.msra.gmra.mrb[16].mxu0 %vm2350_vm11, %v2349_v37  ;;  %v4270_v30 = vld [vmem:[%s5685_s6 + $0x150] sm:$0xff]  }
 0x400   :  { %2429 = vmatpush1.bf16.msra.mxu0 %v5311_v11  ;;  %2810 = vmatpush1.bf16.msra.mxu1 %v4230_v15  ;;  %v4271_v37 = vld [vmem:[%s5685_s6 + $0x110] sm:$0xff]   ;;  %v4272_v15 = vld [vmem:[%s5685_s6 + $0x158] sm:$0xff]  }
 0x401   :  { %2430 = vmatprep.subr.bf16.mxu0 %v5327_v34  ;;  %2811 = vmatprep.subr.bf16.mxu1 %v4313_v2 }
 0x402   :  { %2460 = vmatprep.mubr.bf16.mxu0 %v4313_v2 }
 0x404   :  { %2431 = vmatpush1.bf16.msra.mxu0 %v5329_v45  ;;  %2812 = vmatpush1.bf16.msra.mxu1 %v4231_v7  ;;  %v4273_v7 = vld [vmem:[%s5685_s6 + $0x118] sm:$0xff]  }
 0x405   :  { %2432 = vmatprep.subr.bf16.mxu0 %v5345_v36  ;;  %2813 = vmatprep.subr.bf16.mxu1 %v4313_v2 }
 0x408   :  { %2433 = vmatpush1.bf16.msra.mxu0 %v5348_v40  ;;  %2814 = vmatpush1.bf16.msra.mxu1 %v4232_v14  ;;  %v4274_v14 = vld [vmem:[%s5685_s6 + $0x160] sm:$0xff]  }
 0x409   :  { %2434 = vmatprep.subr.bf16.mxu0 %v5357_v63  ;;  %2815 = vmatprep.subr.bf16.mxu1 %v4313_v2 }
 0x40c   :  { %2435 = vmatpush1.bf16.msra.mxu0 %v5359_v9  ;;  %2816 = vmatpush1.bf16.msra.mxu1 %v4233_v33  ;;  %v4316_v33 = vmov 0.0  }
 0x40d   :  { %2817 = vmatprep.subr.bf16.mxu1 %v4313_v2  ;;  %2548 = vmatprep.subr.bf16.mxu0 %v4313_v2 }
 0x40f   :  { %3702 = vmatmul.mubr.msk.bf16.vlgmr.msra.gmra.mrb[20].mxu0 %vm2350_vm11, %v3701_v32 }
 0x410   :  { %2818 = vmatpush1.bf16.msra.mxu1 %v4234_v58  ;;  %2549 = vmatpush1.bf16.msra.mxu0 %v4239_v0 }
 0x411   :  { %2819 = vmatprep.subr.bf16.mxu1 %v4313_v2  ;;  %2550 = vmatprep.subr.bf16.mxu0 %v4313_v2 }
 0x414   :  { %2820 = vmatpush1.bf16.msra.mxu1 %v4235_v5  ;;  %2551 = vmatpush1.bf16.msra.mxu0 %v4240_v8 }
 0x415   :  { %2821 = vmatprep.subr.bf16.mxu1 %v4313_v2  ;;  %2552 = vmatprep.subr.bf16.mxu0 %v4313_v2 }
 0x418   :  { %2822 = vmatpush1.bf16.msra.mxu1 %v4236_v10  ;;  %2553 = vmatpush1.bf16.msra.mxu0 %v4241_v48 }
 0x419   :  { %2823 = vmatprep.subr.bf16.mxu1 %v4313_v2  ;;  %2554 = vmatprep.subr.bf16.mxu0 %v4313_v2 }
 0x41c   :  { %2824 = vmatpush1.bf16.msra.mxu1 %v4237_v24  ;;  %2555 = vmatpush1.bf16.msra.mxu0 %v4242_v20 }
 0x41d   :  { %2825 = vmatprep.subr.bf16.mxu1 %v4313_v2  ;;  %2556 = vmatprep.subr.bf16.mxu0 %v4313_v2 }
 0x420   :  { %2826 = vmatpush1.bf16.msra.mxu1 %v4238_v50  ;;  %2557 = vmatpush1.bf16.msra.mxu0 %v4243_v54 }
 0x421   :  { %3020 = vmatprep.subr.bf16.mxu1 %v5309_v17  ;;  %2558 = vmatprep.subr.bf16.mxu0 %v4313_v2 }
 0x424   :  { %2559 = vmatpush1.bf16.msra.mxu0 %v4244_v55 }
 0x425   :  { %2560 = vmatprep.subr.bf16.mxu0 %v4313_v2 }
 0x428   :  { %2561 = vmatpush1.bf16.msra.mxu0 %v4245_v4 }
 0x429   :  { %2562 = vmatprep.subr.bf16.mxu0 %v4313_v2 }
 0x42c   :  { %2563 = vmatpush1.bf16.msra.mxu0 %v4246_v3 }
 0x42d   :  { %2564 = vmatprep.subr.bf16.mxu0 %v4313_v2 }
 0x430   :  { %2565 = vmatpush1.bf16.msra.mxu0 %v4247_v16 }
 0x431   :  { %2645 = vmatprep.subr.bf16.mxu0 %v4313_v2 }
 0x4d2   :  { %v2724_v42 = vpop.f32.mrb[32].mxu1  ;;  %v2396_v47 = vpop.f32.mrb[16].mxu0 }
 0x4d3   :  { %v2731_v21 = vpack.c.bf16 %v2724_v42, %v2724_v42  ;;  %v2726_v18 = vpop.f32.mrb[33].mxu1  ;;  %v2398_v23 = vpop.f32.mrb[17].mxu0  ;;  %v2403_v60 = vpack.c.bf16 %v2396_v47, %v2396_v47 }
 0x4d4   :  { %v2732_v25 = vpack.c.bf16 %v2726_v18, %v2726_v18  ;;  %v2400_v12 = vpop.f32.mrb[18].mxu0  ;;  %v2728_v62 = vpop.f32.mrb[34].mxu1  ;;  %v2404_v29 = vpack.c.bf16 %v2398_v23, %v2398_v23 }
 0x4d5   :  { %v2401_v51 = vpop.f32.mrb[19].mxu0  ;;  %v2729_v35 = vpop.f32.mrb[35].mxu1 }
 0x4d6   :  { %3770 = vmatprep.mubr.msk.bf16.mxu1 %vm2544_vm12, %v2732_v25  ;;  %v4275_v51 = vld [vmem:[%s5687_s8] sm:$0xff]  }
 0x4d7   :  { %2842 = vmatmul.mubr.bf16.vlgmr.msra.gmra.mrb[36].mxu1 %v2731_v21 }
 0x4d8   :  { %3021 = vmatpush1.bf16.msra.mxu1 %v5311_v11  ;;  %3052 = vmatprep.mubr.bf16.mxu1 %v4313_v2 }
 0x4d9   :  { %3022 = vmatprep.subr.bf16.mxu1 %v5327_v34 }
 0x4dc   :  { %3023 = vmatpush1.bf16.msra.mxu1 %v5329_v45 }
 0x4dd   :  { %3024 = vmatprep.subr.bf16.mxu1 %v5345_v36 }
 0x4e0   :  { %3025 = vmatpush1.bf16.msra.mxu1 %v5348_v40 }
 0x4e1   :  { %3026 = vmatprep.subr.bf16.mxu1 %v5357_v63 }
 0x4e2   :  { %v2462_v49 = vpop.f32.mrb[20].mxu0 }
 0x4e3   :  { %v2464_v19 = vpop.f32.mrb[21].mxu0  ;;  %v2469_v27 = vpack.c.bf16 %v2462_v49, %v2462_v49 }
 0x4e4   :  { %v2470_v31 = vpack.c.bf16 %v2464_v19, %v2464_v19  ;;  %3027 = vmatpush1.bf16.msra.mxu1 %v5359_v9  ;;  %v2466_v56 = vpop.f32.mrb[22].mxu0  ;;  %v4276_v19 = vld [vmem:[%s5687_s8 + $0x8] sm:$0xff]  }
 0x4e5   :  { %v2467_v52 = vpop.f32.mrb[23].mxu0  ;;  %3139 = vmatprep.subr.bf16.mxu1 %v4313_v2  ;;  %v4278_v56 = vld [vmem:[%s5687_s8 + $0x18] sm:$0xff]  }
 0x4e6   :  { %3730 = vmatprep.mubr.msk.bf16.mxu0 %vm2544_vm12, %v2470_v31  ;;  %v4277_v31 = vld [vmem:[%s5687_s8 + $0x10] sm:$0xff]   ;;  %v4282_v52 = vld [vmem:[%s5687_s8 + $0x38] ss:$0 sps:$4 sm:$0xff]  }
 0x4e7   :  { %2581 = vmatmul.mubr.bf16.vlgmr.msra.gmra.mrb[24].mxu0 %v2469_v27  ;;  %3802 = vmatmul.mubr.msk.bf16.vlgmr.msra.gmra.mrb[40].mxu1 %vm2350_vm11, %v3801_v6  ;;  %v4280_v6 = vld [vmem:[%s5687_s8 + $0x28] sm:$0xff]   ;;  %v4281_v27 = vld [vmem:[%s5687_s8 + $0x30] sm:$0xff]  }
 0x4e8   :  { %2646 = vmatpush1.bf16.msra.mxu0 %v4248_v26  ;;  %3740 = vmatprep.mubr.msk.bf16.mxu0 %vm2544_vm12, %v2404_v29  ;;  %v4279_v26 = vld [vmem:[%s5687_s8 + $0x20] sm:$0xff]   ;;  %v3263_v29 = vsel %vm1927_vm9, %v4282_v52, 0 }
 0x4e9   :  { %2647 = vmatprep.subr.bf16.mxu0 %v4313_v2 }
 0x4ec   :  { %2648 = vmatpush1.bf16.msra.mxu0 %v4249_v38 }
 0x4ed   :  { %2649 = vmatprep.subr.bf16.mxu0 %v4313_v2 }
 0x4f0   :  { %2650 = vmatpush1.bf16.msra.mxu0 %v4250_v41 }
 0x4f1   :  { %2651 = vmatprep.subr.bf16.mxu0 %v4313_v2 }
 0x4f4   :  { %2652 = vmatpush1.bf16.msra.mxu0 %v4251_v13 }
 0x4f5   :  { %2653 = vmatprep.subr.bf16.mxu0 %v4313_v2 }
 0x4f8   :  { %2654 = vmatpush1.bf16.msra.mxu0 %v4252_v46 }
 0x4f9   :  { %2655 = vmatprep.subr.bf16.mxu0 %v4313_v2 }
 0x4fc   :  { %2656 = vmatpush1.bf16.msra.mxu0 %v4253_v39 }
 0x4fd   :  { %2657 = vmatprep.subr.bf16.mxu0 %v4313_v2 }
 0x500   :  { %2658 = vmatpush1.bf16.msra.mxu0 %v4254_v1 }
 0x501   :  { %2659 = vmatprep.subr.bf16.mxu0 %v4313_v2 }
 0x504   :  { %2660 = vmatpush1.bf16.msra.mxu0 %v4255_v53 }
 0x505   :  { %2661 = vmatprep.subr.bf16.mxu0 %v4313_v2 }
 0x508   :  { %2662 = vmatpush1.bf16.msra.mxu0 %v4256_v57  ;;  %v3831_v57 = vld [vmem:[%s5686_s7] ss:$0 sm:$0xff] }
 0x509   :  { %2855 = vmatprep.subr.bf16.mxu0 %v5309_v17  ;;  %v3771_v17 = vld [vmem:[%s5684_s5 + $0x3] sm:$0x1] }
 0x50b   :  { %2678 = vmatmul.mubr.bf16.vlgmr.msra.gmra.mrb[28].mxu0 %v2403_v60 }
 0x50c   :  { %2856 = vmatpush1.bf16.msra.mxu0 %v5311_v11  ;;  %2887 = vmatprep.mubr.bf16.mxu0 %v4313_v2  ;;  %v4257_v11 = vld [vmem:[%s5685_s6 + $0xd8] sm:$0xff]  }
 0x50d   :  { %2857 = vmatprep.subr.bf16.mxu0 %v5327_v34  ;;  %v4258_v34 = vld [vmem:[%s5685_s6 + $0x120] sm:$0xff]  }
 0x50e   :  { %3140 = vmatpush1.bf16.msra.mxu1 %v4258_v34 }
 0x50f   :  { %3141 = vmatprep.subr.bf16.mxu1 %v4313_v2 }
 0x510   :  { %2858 = vmatpush1.bf16.msra.mxu0 %v5329_v45  ;;  %v4259_v45 = vld [vmem:[%s5685_s6 + $0xe0] sm:$0xff]  }
 0x511   :  { %2859 = vmatprep.subr.bf16.mxu0 %v5345_v36  ;;  %v4260_v36 = vld [vmem:[%s5685_s6 + $0x128] sm:$0xff]  }
 0x512   :  { %3142 = vmatpush1.bf16.msra.mxu1 %v4260_v36  ;;  %v4283_v36 = vld [vmem:[%s5689_s10] sm:$0xff]  }
 0x513   :  { %3143 = vmatprep.subr.bf16.mxu1 %v4313_v2 }
 0x514   :  { %2860 = vmatpush1.bf16.msra.mxu0 %v5348_v40  ;;  %v4261_v40 = vld [vmem:[%s5685_s6 + $0xe8] sm:$0xff]  }
 0x515   :  { %2861 = vmatprep.subr.bf16.mxu0 %v5357_v63  ;;  %v4268_v63 = vld [vmem:[%s5685_s6 + $0x148] sm:$0xff]  }
 0x516   :  { %3144 = vmatpush1.bf16.msra.mxu1 %v4262_v28  ;;  %v4284_v28 = vld [vmem:[%s5689_s10 + $0x8] sm:$0xff]  }
 0x517   :  { %3145 = vmatprep.subr.bf16.mxu1 %v4313_v2 }
 0x518   :  { %2862 = vmatpush1.bf16.msra.mxu0 %v5359_v9  ;;  %v4269_v9 = vld [vmem:[%s5685_s6 + $0x108] sm:$0xff]  }
 0x519   :  { %2974 = vmatprep.subr.bf16.mxu0 %v4313_v2 }
 0x51a   :  { %3146 = vmatpush1.bf16.msra.mxu1 %v4264_v22  ;;  %v4286_v22 = vld [vmem:[%s5689_s10 + $0x18] sm:$0xff]  }
 0x51b   :  { %3772 = vmatmul.mubr.msk.bf16.vlgmr.msra.gmra.mrb[32].mxu0 %vm2350_vm11, %v3771_v17  ;;  %3147 = vmatprep.subr.bf16.mxu1 %v4313_v2 }
 0x51c   :  { %2975 = vmatpush1.bf16.msra.mxu0 %v4257_v11 }
 0x51d   :  { %2976 = vmatprep.subr.bf16.mxu0 %v4313_v2 }
 0x51e   :  { %3148 = vmatpush1.bf16.msra.mxu1 %v4266_v44  ;;  %v4288_v44 = vld [vmem:[%s5689_s10 + $0x28] ss:$0 sps:$4 sm:$0x33]  }
 0x51f   :  { %3149 = vmatprep.subr.bf16.mxu1 %v4313_v2 }
 0x520   :  { %2977 = vmatpush1.bf16.msra.mxu0 %v4259_v45 }
 0x521   :  { %2978 = vmatprep.subr.bf16.mxu0 %v4313_v2 }
 0x522   :  { %3150 = vmatpush1.bf16.msra.mxu1 %v4268_v63  ;;  %v3832_v63 = vld [vmem:[%s5688_s9] ss:$0 sm:$0xff]  ;;  %s4289_s9 = scalar_lea.vmem %s3414_s29, 32 }
 0x523   :  { %3151 = vmatprep.subr.bf16.mxu1 %v4313_v2  ;;  %p4290_p0 = scmp.ne.s32.totalorder %s3414_s29, %s4289_s9  ;;  %p4295_p2 = scmp.lt.s32.totalorder %s4289_s9, %s4289_s9 }
 0x524   :  { %2979 = vmatpush1.bf16.msra.mxu0 %v4261_v40 }
 0x525   :  { %2980 = vmatprep.subr.bf16.mxu0 %v4313_v2  ;;  %p4296_p3 = por %p4295_p2, %p4294_p1 }
 0x526   :  { %3152 = vmatpush1.bf16.msra.mxu1 %v4270_v30 }
 0x527   :  { %3153 = vmatprep.subr.bf16.mxu1 %v4313_v2  ;;  %p4297_p4 = pnand %p4296_p3, %p4290_p0 }
 0x528   :  { %2981 = vmatpush1.bf16.msra.mxu0 %v4263_v61  ;;  %v4285_v61 = vld [vmem:[%s5689_s10 + $0x10] sm:$0xff]  }
 0x529   :  { %2982 = vmatprep.subr.bf16.mxu0 %v4313_v2 }
 0x52a   :  { %3154 = vmatpush1.bf16.msra.mxu1 %v4272_v15 }
 0x52b   :  { %3155 = vmatprep.subr.bf16.mxu1 %v4313_v2 }
 0x52c   :  { %2983 = vmatpush1.bf16.msra.mxu0 %v4265_v43  ;;  %v4287_v43 = vld [vmem:[%s5689_s10 + $0x20] sm:$0xff]  }
 0x52d   :  { %2984 = vmatprep.subr.bf16.mxu0 %v4313_v2 }
 0x52e   :  { %3156 = vmatpush1.bf16.msra.mxu1 %v4274_v14 }
 0x530   :  { %2985 = vmatpush1.bf16.msra.mxu0 %v4267_v59  ;;  %v3364_v59 = vsel %vm3362_vm15, %v4288_v44, 0 }
 0x531   :  { %2986 = vmatprep.subr.bf16.mxu0 %v4313_v2 }
 0x534   :  { %2987 = vmatpush1.bf16.msra.mxu0 %v4269_v9 }
 0x535   :  { %2988 = vmatprep.subr.bf16.mxu0 %v4313_v2 }
 0x538   :  { %2989 = vmatpush1.bf16.msra.mxu0 %v4271_v37 }
 0x539   :  { %2990 = vmatprep.subr.bf16.mxu0 %v4313_v2 }
 0x53c   :  { %2991 = vmatpush1.bf16.msra.mxu0 %v4273_v7 }
 0x53d   :  { %3866 = vmatprep.subr.bf16.mxu0 %v4316_v33 }
 0x5aa   :  { %v2843_v32 = vpop.f32.mrb[36].mxu1 }
 0x5ab   :  { %v2845_v58 = vpop.f32.mrb[37].mxu1 }
 0x5ac   :  { %v2846_v0 = vpop.f32.mrb[38].mxu1  ;;  %v3842_v58 = vld [vmem:[%s5690_s11] ss:$0 sm:$0xff] }
 0x5ad   :  { %v2847_v5 = vpop.f32.mrb[39].mxu1 }
 0x5ba   :  { %v2582_v8 = vpop.f32.mrb[24].mxu0  ;;  %v3054_v10 = vpop.f32.mrb[40].mxu1 }
 0x5bb   :  { %v2584_v48 = vpop.f32.mrb[25].mxu0  ;;  %v3061_v24 = vpack.c.bf16 %v3054_v10, %v3054_v10  ;;  %v3056_v20 = vpop.f32.mrb[41].mxu1 }
 0x5bc   :  { %v2585_v50 = vpop.f32.mrb[26].mxu0  ;;  %v3062_v2 = vpack.c.bf16 %v3056_v20, %v3056_v20  ;;  %v3058_v54 = vpop.f32.mrb[42].mxu1 }
 0x5bd   :  { %v2586_v55 = vpop.f32.mrb[27].mxu0  ;;  %v3059_v4 = vpop.f32.mrb[43].mxu1 }
 0x5be   :  { %3830 = vmatprep.mubr.msk.bf16.mxu1 %vm2544_vm12, %v3062_v2 }
 0x5bf   :  { %3172 = vmatmul.mubr.bf16.vlgmr.msra.gmra.mrb[44].mxu1 %v3061_v24 }
 0x5de   :  { %v2679_v3 = vpop.f32.mrb[28].mxu0 }
 0x5df   :  { %v2680_v16 = vadd.f32 %v2679_v3, %v2582_v8  ;;  %v2681_v42 = vpop.f32.mrb[29].mxu0 }
 0x5e0   :  { %v2682_v47 = vpop.f32.mrb[30].mxu0 }
 0x5e1   :  { %v2849_v21 = vadd.f32 %v2843_v32, %v2680_v16  ;;  %v2683_v18 = vpop.f32.mrb[31].mxu0 }
 0x5ee   :  { %v2889_v23 = vpop.f32.mrb[32].mxu0 }
 0x5ef   :  { %v2891_v25 = vpop.f32.mrb[33].mxu0  ;;  %v2896_v35 = vpack.c.bf16 %v2889_v23, %v2889_v23 }
 0x5f0   :  { %v2897_v12 = vpack.c.bf16 %v2891_v25, %v2891_v25  ;;  %v2893_v62 = vpop.f32.mrb[34].mxu0 }
 0x5f1   :  { %v2894_v49 = vpop.f32.mrb[35].mxu0 }
 0x5f2   :  { %3800 = vmatprep.mubr.msk.bf16.mxu0 %vm2544_vm12, %v2897_v12 }
 0x5f3   :  { %3007 = vmatmul.mubr.bf16.vlgmr.msra.gmra.mrb[36].mxu0 %v2896_v35 }
 0x5f4   :  { %3867 = vmatpush3.bf16.msra.mxu0 %v4275_v51  ;;  %3882 = vmatprep.mubr.msk.bf16.mxu0 %vm4317_vm13, %v4316_v33 }
 0x5f5   :  { %3868 = vmatprep.subr.bf16.mxu0 %v4316_v33 }
 0x5f8   :  { %3869 = vmatpush3.bf16.msra.mxu0 %v4276_v19 }
 0x5f9   :  { %3870 = vmatprep.subr.bf16.mxu0 %v4316_v33 }
 0x5fc   :  { %3871 = vmatpush3.bf16.msra.mxu0 %v4277_v31 }
 0x5fd   :  { %3872 = vmatprep.subr.bf16.mxu0 %v4316_v33 }
 0x600   :  { %3873 = vmatpush3.bf16.msra.mxu0 %v4278_v56 }
 0x601   :  { %3874 = vmatprep.subr.bf16.mxu0 %v4316_v33 }
 0x604   :  { %3875 = vmatpush3.bf16.msra.mxu0 %v4279_v26 }
 0x605   :  { %3876 = vmatprep.subr.bf16.mxu0 %v4316_v33 }
 0x608   :  { %3877 = vmatpush3.bf16.msra.mxu0 %v4280_v6 }
 0x609   :  { %3878 = vmatprep.subr.bf16.mxu0 %v4316_v33 }
 0x60c   :  { %3879 = vmatpush3.bf16.msra.mxu0 %v4281_v27 }
 0x60d   :  { %3880 = vmatprep.subr.bf16.mxu0 %v4316_v33 }
 0x610   :  { %3881 = vmatpush3.bf16.msra.mxu0 %v3263_v29 }
 0x611   :  { %3886 = vmatprep.subr.bf16.mxu0 %v4316_v33 }
 0x692   :  { %v3173_v38 = vpop.f32.mrb[44].mxu1 }
 0x693   :  { %v3175_v41 = vpop.f32.mrb[45].mxu1 }
 0x694   :  { %v3176_v13 = vpop.f32.mrb[46].mxu1 }
 0x695   :  { %v3177_v46 = vpop.f32.mrb[47].mxu1 }
 0x6c6   :  { %v3008_v39 = vpop.f32.mrb[36].mxu0 }
 0x6c7   :  { %v3014_v1 = vadd.f32 %v3008_v39, %v2849_v21  ;;  %v3010_v53 = vpop.f32.mrb[37].mxu0 }
 0x6c8   :  { %v3011_v60 = vpop.f32.mrb[38].mxu0 }
 0x6c9   :  { %v3179_v17 = vadd.f32 %v3173_v38, %v3014_v1  ;;  %v3012_v11 = vpop.f32.mrb[39].mxu0 }
 0x6cb   :  { %v3187_v34 = vadd.f32 %v3831_v57, %v3179_v17 }
 0x6cd   :  { %v3188_v45 = vmax.f32 %v3187_v34, 0.0 }
 0x6cf   :  { %v3189_v40 = vpack.c.bf16 %v3188_v45, %v3188_v45 }
 0x6d1   :  { %3883 = vmatmul.mubr.msk.bf16.vlgmr.msra.gmra.mrb[40].mxu0 %vm3257_vm14, %v3189_v40 }
 0x6d2   :  { %3887 = vmatpush3.bf16.msra.mxu0 %v4283_v36  ;;  %3898 = vmatprep.mubr.msk.bf16.mxu0 %vm4317_vm13, %v4316_v33 }
 0x6d3   :  { %3888 = vmatprep.subr.bf16.mxu0 %v4316_v33 }
 0x6d6   :  { %3889 = vmatpush3.bf16.msra.mxu0 %v4284_v28 }
 0x6d7   :  { %3890 = vmatprep.subr.bf16.mxu0 %v4316_v33 }
 0x6da   :  { %3891 = vmatpush3.bf16.msra.mxu0 %v4285_v61 }
 0x6db   :  { %3892 = vmatprep.subr.bf16.mxu0 %v4316_v33 }
 0x6de   :  { %3893 = vmatpush3.bf16.msra.mxu0 %v4286_v22 }
 0x6df   :  { %3894 = vmatprep.subr.bf16.mxu0 %v4316_v33 }
 0x6e2   :  { %3895 = vmatpush3.bf16.msra.mxu0 %v4287_v43 }
 0x6e3   :  { %3896 = vmatprep.subr.bf16.mxu0 %v4316_v33 }
 0x6e6   :  { %3897 = vmatpush3.bf16.msra.mxu0 %v3364_v59 }
 0x7a4   :  { %v3299_v9 = vpop.f32.mrb[40].mxu0 }
 0x7a5   :  { %v3300_v30 = vadd.f32 %v3832_v63, %v3299_v9  ;;  %v3884_v37 = vpop.f32.mrb[41].mxu0 }
 0x7a6   :  { %v3302_v15 = vpop.f32.mrb[42].mxu0 }
 0x7a7   :  { %v3305_v7 = vmax.f32 %v3300_v30, 0.0  ;;  %v3885_v14 = vpop.f32.mrb[43].mxu0 }
 0x7a9   :  { %v3306_v32 = vpack.c.bf16 %v3305_v7, %v3305_v7 }
 0x7ab   :  { %3899 = vmatmul.mubr.msk.bf16.vlgmr.msra.gmra.mrb[44].mxu0 %vm3358_vm0, %v3306_v32 }
 0x87e   :  { %v3400_v33 = vpop.f32.mrb[44].mxu0 }
 0x87f   :  { %v3401_v0 = vadd.f32 %v3842_v58, %v3400_v33  ;;  %v3900_v5 = vpop.f32.mrb[45].mxu0 }
 0x880   :  { %v3403_v8 = vpop.f32.mrb[46].mxu0 }
 0x881   :  { %3406 = vst [vmem:[#allocation2] sm:$0x3] %v3401_v0  ;;  %v3901_v10 = vpop.f32.mrb[47].mxu0 }
 0x882   :  { %4300 = shalt.err (!%p4297_p4)
}
 0x883   :  { %s4301_s11 = scalar_lea.hbm %s5691_s12, 32 }
 0x884   :  { %p4302_p5 = scmp.ne.s32.totalorder %s5691_s12, %s4301_s11  ;;  %p4305_p6 = scmp.lt.u32.totalorder %s4301_s11, %s5691_s12 }
 0x886   :  { %p4307_p7 = pnand %p4305_p6, %p4302_p5 }
 0x888   :  { %4310 = shalt.err (!%p4307_p7)
}
 0x889   :  { %3416 = dma.vmem_to_hbm [thread:$0]  %s3414_s29, 32, %s5691_s12, [#allocation3]  }
 0x88a   :  { %4311 = dma.done.wait [#allocation3], 32  }
 0x88b   :  { %4312 = vsyncadd [#allocation3], 4294967264 }
 0x88c   :  { %3420 = vsyncpa [#allocation3], 1 }

</bundles_post_ra>
